<compile_context>
chip_gen: v5e
topology: v5e:2x2
jax: 0.10.0
libtpu: 0.0.40
codegen_flags: <defaults>
</compile_context>

<pallas_src>
import functools

import jax
import jax.numpy as jnp
from jax.experimental import pallas as pl
from jax.experimental.pallas import tpu as pltpu

CLUSTER_NUM = 6
IN_DIM = 151
H1, H2, H3 = 512, 256, 64


def _multitask_kernel(x_ref, w1_ref, b1_ref, w2_ref, b2_ref, w3_ref, b3_ref,
                      wh_ref, bh_ref, o_ref, *, batch):
    """Single invocation: full forward for all clusters.

    x_ref : (C*B, 151) f32    all clusters' inputs, cluster-major rows
    w1/w2/w3 : bf16 body weights stored (in, out); b1/b2/b3 : f32 biases (1, out)
    wh_ref: (C, 64) f32       per-cluster head weights
    bh_ref: (C, 1)  f32       per-cluster head biases
    o_ref : (C, B)  f32       sigmoid outputs
    """
    # In-kernel bf16 cast of x (free on the VPU relative to the matmuls).
    x = x_ref[...].astype(jnp.bfloat16)                        # (C*B, 151)

    # Shared body: 3 x (Linear -> ReLU -> Dropout(eval)=identity).
    # bf16 MXU operands, f32 accumulation and elementwise math.
    h = jnp.dot(x, w1_ref[...], preferred_element_type=jnp.float32) + b1_ref[...]
    h = jnp.maximum(h, 0.0)
    h = jnp.dot(h.astype(jnp.bfloat16), w2_ref[...],
                preferred_element_type=jnp.float32) + b2_ref[...]
    h = jnp.maximum(h, 0.0)
    h = jnp.dot(h.astype(jnp.bfloat16), w3_ref[...],
                preferred_element_type=jnp.float32) + b3_ref[...]
    h = jnp.maximum(h, 0.0)                                    # (C*B, 64) f32

    # Per-cluster heads on the VPU/XLU (not 6 width-1 MXU matmuls):
    # (C, B, 64) * (C, 1, 64) -> lane reduce over 64 -> (C, B).
    h3 = h.reshape(CLUSTER_NUM, batch, H3)
    logits = jnp.sum(h3 * wh_ref[...][:, None, :], axis=-1) + bh_ref[...]
    o_ref[...] = jax.nn.sigmoid(logits)


def prepare_kernel_params(params):
    """One-time prep: pre-cast body weights to bf16 (stored in HBM, reused per call)."""
    w1, b1, w2, b2, w3, b3, wh, bh = params
    prepped = (w1.astype(jnp.bfloat16), b1,
               w2.astype(jnp.bfloat16), b2,
               w3.astype(jnp.bfloat16), b3,
               wh, bh)
    return jax.block_until_ready(prepped)


def _cost_estimate(C, B):
    cb = C * B
    flops = 2 * cb * (IN_DIM * H1 + H1 * H2 + H2 * H3 + H3)
    bytes_accessed = (
        cb * IN_DIM * 4                                    # x (f32)
        + (IN_DIM * H1 + H1 * H2 + H2 * H3) * 2            # bf16 body weights
        + (H1 + H2 + H3) * 4                               # f32 biases
        + C * H3 * 4 + C * 4                               # head weights + biases
        + cb * 4                                           # output
    )
    return pl.CostEstimate(flops=flops, transcendentals=cb,
                           bytes_accessed=bytes_accessed)


@functools.partial(jax.jit, static_argnames=())
def multitask_dnn_forward(x_stacked, kernel_params):
    """x_stacked: (C, B, 151) float32; kernel_params from prepare_kernel_params.

    Returns a single (C, B) float32 array of sigmoid outputs (row c = cluster c).
    """
    C, B, D = x_stacked.shape
    assert C == CLUSTER_NUM and D == IN_DIM

    w1b, b1, w2b, b2, w3b, b3, wh, bh = kernel_params
    x2d = x_stacked.reshape(C * B, D)                      # contiguous, no copy

    vmem = pl.BlockSpec(memory_space=pltpu.MemorySpace.VMEM)

    out = pl.pallas_call(
        functools.partial(_multitask_kernel, batch=B),
        out_shape=jax.ShapeDtypeStruct((C, B), jnp.float32),
        in_specs=[vmem] * 9,
        out_specs=vmem,
        cost_estimate=_cost_estimate(C, B),
    )(x2d, w1b, b1, w2b, b2, w3b, b3, wh, bh)
    return out


def multitask_dnn_forward_dict(x_stacked, kernel_params):
    """PyTorch-compatible output: dict {cluster: (B, 1) float32}."""
    out = multitask_dnn_forward(x_stacked, kernel_params)
    return {clst: out[clst][:, None] for clst in range(CLUSTER_NUM)}


def init_params(key):
    """Deterministic synthetic parameters (shapes from MultiTaskDnn, layer_type=3).
    Body weights stored as (in, out); head weights stacked to (C, 64) / (C, 1)."""
    ks = jax.random.split(key, 8)
    scale = 0.05
    w1 = scale * jax.random.normal(ks[0], (IN_DIM, H1), jnp.float32)
    b1 = scale * jax.random.normal(ks[1], (1, H1), jnp.float32)
    w2 = scale * jax.random.normal(ks[2], (H1, H2), jnp.float32)
    b2 = scale * jax.random.normal(ks[3], (1, H2), jnp.float32)
    w3 = scale * jax.random.normal(ks[4], (H2, H3), jnp.float32)
    b3 = scale * jax.random.normal(ks[5], (1, H3), jnp.float32)
    wh = scale * jax.random.normal(ks[6], (CLUSTER_NUM, H3), jnp.float32)
    bh = scale * jax.random.normal(ks[7], (CLUSTER_NUM, 1), jnp.float32)
    return (w1, b1, w2, b2, w3, b3, wh, bh)


def _reference_forward(x_stacked, params):
    """Pure-JAX f32 reference (matches PyTorch eval-mode forward)."""
    w1, b1, w2, b2, w3, b3, wh, bh = params
    outs = {}
    for c in range(CLUSTER_NUM):
        h = jnp.maximum(x_stacked[c] @ w1 + b1, 0.0)
        h = jnp.maximum(h @ w2 + b2, 0.0)
        h = jnp.maximum(h @ w3 + b3, 0.0)
        outs[c] = jax.nn.sigmoid(h @ wh[c][:, None] + bh[c][None, :])
    return outs


if __name__ == "__main__":
    key = jax.random.PRNGKey(0)
    k_x, k_p = jax.random.split(key)

    B = 8
    # dict-of-tensors input, stacked: (cluster_num, batch, 151)
    x_stacked = jax.random.normal(k_x, (CLUSTER_NUM, B, IN_DIM), jnp.float32)
    params = init_params(k_p)

    # One-time bf16 pre-cast of body weights (amortized across calls).
    kernel_params = prepare_kernel_params(params)

    head_res = multitask_dnn_forward_dict(x_stacked, kernel_params)
    jax.block_until_ready(head_res)

    ref = _reference_forward(x_stacked, params)
    for c in range(CLUSTER_NUM):
        assert head_res[c].shape == (B, 1)
        # bf16 matmul operands -> loosened tolerance vs the f32 reference.
        assert jnp.allclose(head_res[c], ref[c], atol=2e-2, rtol=2e-2)

    print("KERNEL_OK")
</pallas_src>

<mosaic_0001>
module attributes {stable_mosaic.version = 11 : i64} {
  func.func @_multitask_kernel(%arg0: memref<48x151xf32, #tpu.memory_space<vmem>>, %arg1: memref<151x512xbf16, #tpu.memory_space<vmem>>, %arg2: memref<1x512xf32, #tpu.memory_space<vmem>>, %arg3: memref<512x256xbf16, #tpu.memory_space<vmem>>, %arg4: memref<1x256xf32, #tpu.memory_space<vmem>>, %arg5: memref<256x64xbf16, #tpu.memory_space<vmem>>, %arg6: memref<1x64xf32, #tpu.memory_space<vmem>>, %arg7: memref<6x64xf32, #tpu.memory_space<vmem>>, %arg8: memref<6x1xf32, #tpu.memory_space<vmem>>, %arg9: memref<6x8xf32, #tpu.memory_space<vmem>>) attributes {dimension_semantics = [], scalar_prefetch = 0 : i64, scratch_operands = 0 : i64, tpu.core_type = #tpu.core_type<tc>} {
    %c0 = arith.constant 0 : index
    %c0_0 = arith.constant 0 : index
    %0 = vector.load %arg0[%c0, %c0_0] : memref<48x151xf32, #tpu.memory_space<vmem>>, vector<48x151xf32>
    %1 = arith.truncf %0 : vector<48x151xf32> to vector<48x151xbf16>
    %c0_1 = arith.constant 0 : index
    %c0_2 = arith.constant 0 : index
    %2 = vector.load %arg1[%c0_1, %c0_2] : memref<151x512xbf16, #tpu.memory_space<vmem>>, vector<151x512xbf16>
    %cst = arith.constant dense<0.000000e+00> : vector<48x512xf32>
    %3 = tpu.matmul %1, %2, %cst {dimension_numbers = #tpu.dot_dimension_numbers<[1], [0], [0], [1], [0, 0, 1, 1], [], []>} : vector<48x151xbf16>, vector<151x512xbf16>, vector<48x512xf32> -> vector<48x512xf32>
    %c0_3 = arith.constant 0 : index
    %c0_4 = arith.constant 0 : index
    %4 = vector.load %arg2[%c0_3, %c0_4] : memref<1x512xf32, #tpu.memory_space<vmem>>, vector<1x512xf32>
    %5 = vector.broadcast %4 : vector<1x512xf32> to vector<48x512xf32>
    %6 = arith.addf %3, %5 : vector<48x512xf32>
    %cst_5 = arith.constant 0.000000e+00 : f32
    %7 = vector.broadcast %cst_5 : f32 to vector<48x512xf32>
    %8 = arith.maximumf %6, %7 : vector<48x512xf32>
    %9 = arith.truncf %8 : vector<48x512xf32> to vector<48x512xbf16>
    %c0_6 = arith.constant 0 : index
    %c0_7 = arith.constant 0 : index
    %10 = vector.load %arg3[%c0_6, %c0_7] : memref<512x256xbf16, #tpu.memory_space<vmem>>, vector<512x256xbf16>
    %cst_8 = arith.constant dense<0.000000e+00> : vector<48x256xf32>
    %11 = tpu.matmul %9, %10, %cst_8 {dimension_numbers = #tpu.dot_dimension_numbers<[1], [0], [0], [1], [0, 0, 1, 1], [], []>} : vector<48x512xbf16>, vector<512x256xbf16>, vector<48x256xf32> -> vector<48x256xf32>
    %c0_9 = arith.constant 0 : index
    %c0_10 = arith.constant 0 : index
    %12 = vector.load %arg4[%c0_9, %c0_10] : memref<1x256xf32, #tpu.memory_space<vmem>>, vector<1x256xf32>
    %13 = vector.broadcast %12 : vector<1x256xf32> to vector<48x256xf32>
    %14 = arith.addf %11, %13 : vector<48x256xf32>
    %cst_11 = arith.constant 0.000000e+00 : f32
    %15 = vector.broadcast %cst_11 : f32 to vector<48x256xf32>
    %16 = arith.maximumf %14, %15 : vector<48x256xf32>
    %17 = arith.truncf %16 : vector<48x256xf32> to vector<48x256xbf16>
    %c0_12 = arith.constant 0 : index
    %c0_13 = arith.constant 0 : index
    %18 = vector.load %arg5[%c0_12, %c0_13] : memref<256x64xbf16, #tpu.memory_space<vmem>>, vector<256x64xbf16>
    %cst_14 = arith.constant dense<0.000000e+00> : vector<48x64xf32>
    %19 = tpu.matmul %17, %18, %cst_14 {dimension_numbers = #tpu.dot_dimension_numbers<[1], [0], [0], [1], [0, 0, 1, 1], [], []>} : vector<48x256xbf16>, vector<256x64xbf16>, vector<48x64xf32> -> vector<48x64xf32>
    %c0_15 = arith.constant 0 : index
    %c0_16 = arith.constant 0 : index
    %20 = vector.load %arg6[%c0_15, %c0_16] : memref<1x64xf32, #tpu.memory_space<vmem>>, vector<1x64xf32>
    %21 = vector.broadcast %20 : vector<1x64xf32> to vector<48x64xf32>
    %22 = arith.addf %19, %21 : vector<48x64xf32>
    %cst_17 = arith.constant 0.000000e+00 : f32
    %23 = vector.broadcast %cst_17 : f32 to vector<48x64xf32>
    %24 = arith.maximumf %22, %23 : vector<48x64xf32>
    %25 = vector.shape_cast %24 : vector<48x64xf32> to vector<6x8x64xf32>
    %c0_18 = arith.constant 0 : index
    %c0_19 = arith.constant 0 : index
    %26 = vector.load %arg7[%c0_18, %c0_19] : memref<6x64xf32, #tpu.memory_space<vmem>>, vector<6x64xf32>
    %27 = vector.shape_cast %26 : vector<6x64xf32> to vector<6x1x64xf32>
    %28 = vector.broadcast %27 : vector<6x1x64xf32> to vector<6x8x64xf32>
    %29 = arith.mulf %25, %28 : vector<6x8x64xf32>
    %cst_20 = arith.constant dense<0.000000e+00> : vector<6x8xf32>
    %30 = vector.multi_reduction <add>, %29, %cst_20 [2] : vector<6x8x64xf32> to vector<6x8xf32>
    %c0_21 = arith.constant 0 : index
    %c0_22 = arith.constant 0 : index
    %31 = vector.load %arg8[%c0_21, %c0_22] : memref<6x1xf32, #tpu.memory_space<vmem>>, vector<6x1xf32>
    %32 = vector.broadcast %31 : vector<6x1xf32> to vector<6x8xf32>
    %33 = arith.addf %30, %32 : vector<6x8xf32>
    %34 = arith.negf %33 : vector<6x8xf32>
    %35 = math.exp %34 : vector<6x8xf32>
    %cst_23 = arith.constant 1.000000e+00 : f32
    %36 = vector.broadcast %cst_23 : f32 to vector<6x8xf32>
    %37 = arith.addf %36, %35 : vector<6x8xf32>
    %38 = arith.divf %36, %37 : vector<6x8xf32>
    %c0_24 = arith.constant 0 : index
    %c0_25 = arith.constant 0 : index
    %39 = vector.load %arg9[%c0_24, %c0_25] : memref<6x8xf32, #tpu.memory_space<vmem>>, vector<6x8xf32>
    tpu.vector_store %arg9[%c0_24, %c0_25], %38 {strides = array<i32>} : memref<6x8xf32, #tpu.memory_space<vmem>>, vector<6x8xf32>,
    return
  }
}

</mosaic_0001>

<bundles_post_ra>
// kernel: multitask_dnn_forward.1
= control target key start
LH: loop header
LB: loop body
LE: loop exit
PB: predicated region body
PF: predicated region fallthrough
CT: control target
= control target key end

     0   :  { %14 = vsyncpa [#allocation3], 0  ;;  %s2640_s0 = inlined_call_operand.vmem [shape: f32[48,151], index: 0, kind: input, shape index: {}]   ;;  %s2641_s1 = inlined_call_operand.hbm [shape: bf16[151,512], index: 1, kind: input, shape index: {}]   ;;  %s2642_s2 = inlined_call_operand.vmem [shape: f32[1,512], index: 2, kind: input, shape index: {}]   ;;  %s2643_s3 = inlined_call_operand.hbm [shape: bf16[512,256], index: 3, kind: input, shape index: {}]   ;;  %s2644_s4 = inlined_call_operand.vmem [shape: f32[1,256], index: 4, kind: input, shape index: {}]   ;;  %s2645_s5 = inlined_call_operand.vmem [shape: bf16[256,64], index: 5, kind: input, shape index: {}]   ;;  %s2646_s6 = inlined_call_operand.vmem [shape: f32[1,64], index: 6, kind: input, shape index: {}]   ;;  %s2647_s7 = inlined_call_operand.vmem [shape: f32[6,64], index: 7, kind: input, shape index: {}]   ;;  %s2648_s8 = inlined_call_operand.vmem [shape: f32[6,1], index: 8, kind: input, shape index: {}]   ;;  %s2649_s9 = inlined_call_operand.hbm [shape: f32[6,8], index: 9, kind: output, shape index: {}]  }
   0x1   :  { %15 = vsyncpa [#allocation6], 0 }
   0x2   :  { %16 = vsyncpa [#allocation4], 0  ;;  %s23_s11 = sshll.u32 %s2641_s1, 4  ;;  %s2319_s12 = smov [#allocation2]   ;;  %s24_s11 = int_to_ptr.hbm [resolvable:$true] %s23_s11 }
   0x3   :  { %s25_s13 = sshll.u32 %s2319_s12, 4  ;;  %s38_s16 = sshll.u32 %s2643_s3, 4  ;;  %s26_s13 = int_to_ptr.vmem [resolvable:$true] %s25_s13  ;;  %s39_s16 = int_to_ptr.hbm [resolvable:$true] %s38_s16 }
   0x4   :  { %s2320_s17 = smov 256   ;;  %s2321_s18 = smov 16  }
   0x5   :  { %31 = dma.hbm_to_vmem [thread:$0]  %s24_s11, 4864, %s26_s13, [#allocation3], %s2320_s17, %s2320_s17, %s2321_s18  }
   0x6   :  { %s2322_s19 = smov [#allocation5]   ;;  %s2323_s21 = smov 128  }
   0x7   :  { %s40_s20 = sshll.u32 %s2322_s19, 4  ;;  %s2324_s22 = smov 8   ;;  %s41_s20 = int_to_ptr.vmem [resolvable:$true] %s40_s20 }
   0x8   :  { %46 = dma.hbm_to_vmem [thread:$0]  %s39_s16, 8192, %s41_s20, [#allocation6], %s2323_s21, %s2323_s21, %s2324_s22  }
   0x9   :  { %2313 = dma.done.wait [#allocation3], 4864  }
   0xa   :  { %2314 = vsyncadd [#allocation3], 4294962432 }
   0xb   :  { %2315 = dma.done.wait [#allocation6], 8192  }
   0xc   :  { %2316 = vsyncadd [#allocation6], 4294959104  ;;  %vm332_vm0 = vcmask 1042432   ;;  %vm333_vm1 = vcmask 1043456   ;;  %v2325_v0 = vmov 65535   ;;  %v120_v12 = vld [vmem:[#allocation2 + $0x120] sm:$0xff] }
   0xd   :  { %v334_v1 = vsel %vm332_vm0, 4294967295, %v2325_v0  ;;  %v1720_v2 = vld [vmem:[#allocation2 + $0xe0] sm:$0xf]  ;;  %v2118_v3 = vld [vmem:[#allocation2 + $0xec] sm:$0xf0]  ;;  %v243_v14 = vunpack.c.h.b16 %v120_v12  ;;  %v242_v15 = vunpack.c.l.b16 %v120_v12  ;;  %v67_v32 = vld [vmem:[%s2640_s0 + $0x8] sm:$0xff] }
   0xe   :  { %v2116_v4 = vld [vmem:[#allocation2 + $0xe4] sm:$0xf]  ;;  %v1721_v5 = vor.u32 %v2118_v3, %v1720_v2  ;;  %v1722_v6 = vld [vmem:[#allocation2 + $0xf0] sm:$0xf0]  ;;  %v1704_v7 = vld [vmem:[#allocation2 + $0xc0] sm:$0xf] }
   0xf   :  { %v2114_v8 = vld [vmem:[#allocation2 + $0xcc] sm:$0xf0]  ;;  %v1725_v9 = vor.u32 %v2116_v4, %v1722_v6  ;;  %v2112_v10 = vld [vmem:[#allocation2 + $0xc4] sm:$0xf]  ;;  %v1706_v11 = vld [vmem:[#allocation2 + $0xd0] sm:$0xf0]  ;;  %v283_v20 = vpack.c.b16 %v243_v14, %v243_v14  ;;  %v282_v21 = vpack.c.b16 %v242_v15, %v242_v15 }
  0x10   :  { %348 = vmatpush.bf16.msra.mxu0 %v1721_v5  ;;  %v1705_v13 = vor.u32 %v2114_v8, %v1704_v7  ;;  %v1709_v16 = vor.u32 %v2112_v10, %v1706_v11  ;;  %v2385_v17 = vsel %vm333_vm1, %v334_v1, 0  ;;  %v1688_v18 = vld [vmem:[#allocation2 + $0xa0] sm:$0xf]  ;;  %v2110_v19 = vld [vmem:[#allocation2 + $0xac] sm:$0xf0]  ;;  %v69_v36 = vld [vmem:[%s2640_s0 + $0x18] sm:$0xff] }
  0x11   :  { %396 = vmatpush.bf16.msra.mxu2 %v1725_v9  ;;  %v2108_v22 = vld [vmem:[#allocation2 + $0xa4] sm:$0xf]  ;;  %v1690_v23 = vld [vmem:[#allocation2 + $0xb0] sm:$0xf0]  ;;  %v1736_v26 = vld [vmem:[#allocation2 + $0x100] sm:$0xf]  ;;  %v340_v28 = vand.u32 %v2385_v17, %v283_v20  ;;  %v1689_v29 = vor.u32 %v2110_v19, %v1688_v18  ;;  %v337_v30 = vand.u32 %v2385_v17, %v282_v21  ;;  %v2395_v41 = vpack.c.bf16 %v69_v36, %v67_v32 }
  0x12   :  { %v2120_v24 = vld [vmem:[#allocation2 + $0x104] sm:$0xf]  ;;  %v1738_v25 = vld [vmem:[#allocation2 + $0x110] sm:$0xf0]  ;;  %v2122_v27 = vld [vmem:[#allocation2 + $0x10c] sm:$0xf0]  ;;  %v1693_v31 = vor.u32 %v2108_v22, %v1690_v23 }
  0x13   :  { %v1672_v33 = vld [vmem:[#allocation2 + $0x80] sm:$0xf]  ;;  %v2106_v34 = vld [vmem:[#allocation2 + $0x8c] sm:$0xf0]  ;;  %426 = vmatpush.bf16.msra.mxu3 %v340_v28  ;;  %378 = vmatpush.bf16.msra.mxu1 %v337_v30  ;;  %v1741_v35 = vor.u32 %v2120_v24, %v1738_v25  ;;  %v1737_v37 = vor.u32 %v2122_v27, %v1736_v26  ;;  %v2104_v38 = vld [vmem:[#allocation2 + $0x84] sm:$0xf] }
  0x14   :  { %349 = vmatpush.bf16.msra.mxu0 %v1705_v13  ;;  %v1674_v39 = vld [vmem:[#allocation2 + $0x90] sm:$0xf0]  ;;  %v1673_v40 = vor.u32 %v2106_v34, %v1672_v33  ;;  %v1656_v43 = vld [vmem:[#allocation2 + $0x60] sm:$0xf]  ;;  %v2102_v44 = vld [vmem:[#allocation2 + $0x6c] sm:$0xf0] }
  0x15   :  { %397 = vmatpush.bf16.msra.mxu2 %v1709_v16  ;;  %v1677_v42 = vor.u32 %v2104_v38, %v1674_v39  ;;  %vm322_vm2 = vcmask 187392   ;;  %v2100_v45 = vld [vmem:[#allocation2 + $0x64] sm:$0xf]  ;;  %v1658_v46 = vld [vmem:[#allocation2 + $0x70] sm:$0xf0]  ;;  %v121_v47 = vld [vmem:[#allocation2 + $0x128] sm:$0xff]  ;;  %v1657_v49 = vor.u32 %v2102_v44, %v1656_v43 }
  0x16   :  { %v1728_v48 = vld [vmem:[#allocation2 + $0xe8] sm:$0xf]  ;;  %v1640_v50 = vld [vmem:[#allocation2 + $0x40] sm:$0xf]  ;;  %v2119_v51 = vld [vmem:[#allocation2 + $0xf4] sm:$0xf0]  ;;  %v244_v52 = vunpack.c.l.b16 %v121_v47  ;;  %v1661_v53 = vor.u32 %v2100_v45, %v1658_v46  ;;  %v245_v7 = vunpack.c.h.b16 %v121_v47 }
  0x17   :  { %427 = vmatpush.bf16.msra.mxu3 %v1741_v35  ;;  %379 = vmatpush.bf16.msra.mxu1 %v1737_v37  ;;  %v2098_v54 = vld [vmem:[#allocation2 + $0x4c] sm:$0xf0]  ;;  %v1729_v55 = vor.u32 %v2119_v51, %v1728_v48  ;;  %v1712_v56 = vld [vmem:[#allocation2 + $0xc8] sm:$0xf]  ;;  %v2115_v57 = vld [vmem:[#allocation2 + $0xd4] sm:$0xf0] }
  0x18   :  { %350 = vmatpush.bf16.msra.mxu0 %v1689_v29  ;;  %v2096_v58 = vld [vmem:[#allocation2 + $0x44] sm:$0xf]  ;;  %v1642_v59 = vld [vmem:[#allocation2 + $0x50] sm:$0xf0]  ;;  %v284_v60 = vpack.c.b16 %v244_v52, %v244_v52  ;;  %v1713_v61 = vor.u32 %v2115_v57, %v1712_v56  ;;  %v1641_v62 = vor.u32 %v2098_v54, %v1640_v50  ;;  %v1696_v0 = vld [vmem:[#allocation2 + $0xa8] sm:$0xf]  ;;  %v285_v22 = vpack.c.b16 %v245_v7, %v245_v7 }
  0x19   :  { %398 = vmatpush.bf16.msra.mxu2 %v1693_v31  ;;  %v2111_v1 = vld [vmem:[#allocation2 + $0xb4] sm:$0xf0]  ;;  %v1645_v2 = vor.u32 %v2096_v58, %v1642_v59  ;;  %v1624_v3 = vld [vmem:[#allocation2 + $0x20] sm:$0xf]  ;;  %v2094_v4 = vld [vmem:[#allocation2 + $0x2c] sm:$0xf0] }
  0x1a   :  { %1753 = vmatmul.msk.bf16.vlgmr.msra.gmra.mxu3 %vm322_vm2, %v2395_v41  ;;  %1750 = vmatmul.msk.bf16.vlgmr.msra.gmra.mxu1 %vm322_vm2, %v2395_v41  ;;  %v343_v63 = vand.u32 %v2385_v17, %v284_v60  ;;  %v2092_v5 = vld [vmem:[#allocation2 + $0x24] sm:$0xf]  ;;  %v1626_v6 = vld [vmem:[#allocation2 + $0x30] sm:$0xf0]  ;;  %v1608_v8 = vld [vmem:[#allocation2] sm:$0xf]  ;;  %v1697_v9 = vor.u32 %v2111_v1, %v1696_v0  ;;  %v1625_v10 = vor.u32 %v2094_v4, %v1624_v3 }
  0x1b   :  { %444 = vmatpush.bf16.msrb.mxu1 %v1729_v55  ;;  %v71_v11 = vld [vmem:[%s2640_s0 + $0x28] sm:$0xff]  ;;  %v2090_v12 = vld [vmem:[#allocation2 + $0xc] sm:$0xf0]  ;;  %v2107_v14 = vld [vmem:[#allocation2 + $0x94] sm:$0xf0]  ;;  %v1629_v15 = vor.u32 %v2092_v5, %v1626_v6  ;;  %v346_v34 = vand.u32 %v2385_v17, %v285_v22  ;;  %vm1387_vm3 = vcmask 523264  }
  0x1c   :  { %351 = vmatpush.bf16.msra.mxu0 %v1673_v40  ;;  %474 = vmatpush.bf16.msrb.mxu3 %v343_v63  ;;  %v1680_v13 = vld [vmem:[#allocation2 + $0x88] sm:$0xf]  ;;  %v2123_v18 = vld [vmem:[#allocation2 + $0x114] sm:$0xf0]  ;;  %v2088_v20 = vld [vmem:[#allocation2 + $0x4] sm:$0xf]  ;;  %v1609_v26 = vor.u32 %v2090_v12, %v1608_v8 }
  0x1d   :  { %399 = vmatpush.bf16.msra.mxu2 %v1677_v42  ;;  %v1744_v16 = vld [vmem:[#allocation2 + $0x108] sm:$0xf]  ;;  %v73_v19 = vld [vmem:[%s2640_s0 + $0x38] sm:$0xff]  ;;  %v1610_v21 = vld [vmem:[#allocation2 + $0x10] sm:$0xf0]  ;;  %v1681_v25 = vor.u32 %v2107_v14, %v1680_v13  ;;  %s1595_s15 = sshll.u32 %s2649_s9, 4  ;;  %s1596_s15 = int_to_ptr.hbm [resolvable:$true] %s1595_s15 }
  0x1e   :  { %v1745_v23 = vor.u32 %v2123_v18, %v1744_v16  ;;  %v66_v24 = vld [vmem:[%s2640_s0] sm:$0xff]  ;;  %v68_v27 = vld [vmem:[%s2640_s0 + $0x10] sm:$0xff]  ;;  %v1664_v28 = vld [vmem:[#allocation2 + $0x68] sm:$0xf]  ;;  %v2414_v30 = vpack.c.bf16 %v73_v19, %v71_v11  ;;  %v1613_v31 = vor.u32 %v2088_v20, %v1610_v21 }
  0x1f   :  { %445 = vmatpush.bf16.msrb.mxu1 %v1713_v61  ;;  %v2103_v29 = vld [vmem:[#allocation2 + $0x74] sm:$0xf0]  ;;  %v2117_v32 = vld [vmem:[#allocation2 + $0xec] sm:$0xf]  ;;  %v1730_v33 = vld [vmem:[#allocation2 + $0xf8] sm:$0xf0]  ;;  %v2417_v35 = vpack.c.bf16 %v68_v27, %v66_v24 }
  0x20   :  { %352 = vmatpush.bf16.msra.mxu0 %v1657_v49  ;;  %475 = vmatpush.bf16.msrb.mxu3 %v1745_v23  ;;  %v1665_v36 = vor.u32 %v2103_v29, %v1664_v28  ;;  %v2121_v37 = vld [vmem:[#allocation2 + $0x10c] sm:$0xf]  ;;  %v1746_v38 = vld [vmem:[#allocation2 + $0x118] sm:$0xf0]  ;;  %v1733_v39 = vor.u32 %v2117_v32, %v1730_v33  ;;  %v1648_v40 = vld [vmem:[#allocation2 + $0x48] sm:$0xf] }
  0x21   :  { %400 = vmatpush.bf16.msra.mxu2 %v1661_v53  ;;  %v2099_v42 = vld [vmem:[#allocation2 + $0x54] sm:$0xf0]  ;;  %v2113_v43 = vld [vmem:[#allocation2 + $0xcc] sm:$0xf]  ;;  %v1714_v44 = vld [vmem:[#allocation2 + $0xd8] sm:$0xf0]  ;;  %v1749_v17 = vor.u32 %v2121_v37, %v1746_v38 }
  0x22   :  { %v1649_v45 = vor.u32 %v2099_v42, %v1648_v40  ;;  %v1717_v46 = vor.u32 %v2113_v43, %v1714_v44  ;;  %v1632_v47 = vld [vmem:[#allocation2 + $0x28] sm:$0xf]  ;;  %v2095_v48 = vld [vmem:[#allocation2 + $0x34] sm:$0xf0]  ;;  %v2109_v49 = vld [vmem:[#allocation2 + $0xac] sm:$0xf] }
  0x23   :  { %446 = vmatpush.bf16.msrb.mxu1 %v1697_v9  ;;  %v1698_v50 = vld [vmem:[#allocation2 + $0xb8] sm:$0xf0]  ;;  %v1633_v51 = vor.u32 %v2095_v48, %v1632_v47  ;;  %v1616_v53 = vld [vmem:[#allocation2 + $0x8] sm:$0xf]  ;;  %v2091_v54 = vld [vmem:[#allocation2 + $0x14] sm:$0xf0] }
  0x24   :  { %353 = vmatpush.bf16.msra.mxu0 %v1641_v62  ;;  %v1701_v52 = vor.u32 %v2109_v49, %v1698_v50  ;;  %v2105_v55 = vld [vmem:[#allocation2 + $0x8c] sm:$0xf]  ;;  %v1682_v56 = vld [vmem:[#allocation2 + $0x98] sm:$0xf0]  ;;  %v1617_v59 = vor.u32 %v2091_v54, %v1616_v53  ;;  %v70_v60 = vld [vmem:[%s2640_s0 + $0x20] sm:$0xff] }
  0x25   :  { %401 = vmatpush.bf16.msra.mxu2 %v1645_v2  ;;  %v75_v57 = vld [vmem:[%s2640_s0 + $0x48] sm:$0xff]  ;;  %v77_v58 = vld [vmem:[%s2640_s0 + $0x58] sm:$0xff]  ;;  %v72_v61 = vld [vmem:[%s2640_s0 + $0x30] sm:$0xff]  ;;  %v1685_v62 = vor.u32 %v2105_v55, %v1682_v56 }
  0x26   :  { %v83_v63 = vpack.c.bf16 %v77_v58, %v75_v57  ;;  %v2101_v0 = vld [vmem:[#allocation2 + $0x6c] sm:$0xf]  ;;  %v1666_v1 = vld [vmem:[#allocation2 + $0x78] sm:$0xf0]  ;;  %v80_v2 = vpack.c.bf16 %v72_v61, %v70_v60  ;;  %v74_v12 = vld [vmem:[%s2640_s0 + $0x40] sm:$0xff] }
  0x27   :  { %447 = vmatpush.bf16.msrb.mxu1 %v1681_v25  ;;  %v1669_v3 = vor.u32 %v2101_v0, %v1666_v1  ;;  %v2097_v4 = vld [vmem:[#allocation2 + $0x4c] sm:$0xf]  ;;  %v1650_v5 = vld [vmem:[#allocation2 + $0x58] sm:$0xf0]  ;;  %v76_v13 = vld [vmem:[%s2640_s0 + $0x50] sm:$0xff] }
  0x28   :  { %354 = vmatpush.bf16.msra.mxu0 %v1625_v10  ;;  %v1653_v6 = vor.u32 %v2097_v4, %v1650_v5  ;;  %v2093_v7 = vld [vmem:[#allocation2 + $0x2c] sm:$0xf]  ;;  %v1634_v8 = vld [vmem:[#allocation2 + $0x38] sm:$0xf0]  ;;  %v1820_v16 = vld [vmem:[#allocation5 + $0x70] sm:$0xf] }
  0x29   :  { %402 = vmatpush.bf16.msra.mxu2 %v1629_v15  ;;  %v1637_v9 = vor.u32 %v2093_v7, %v1634_v8  ;;  %v2089_v10 = vld [vmem:[#allocation2 + $0xc] sm:$0xf]  ;;  %v1618_v11 = vld [vmem:[#allocation2 + $0x18] sm:$0xf0]  ;;  %v82_v15 = vpack.c.bf16 %v76_v13, %v74_v12  ;;  %v2139_v18 = vld [vmem:[#allocation5 + $0x74] sm:$0xf0] }
  0x2a   :  { %1754 = vmatmul.msk.bf16.gmra.mxu3 %vm322_vm2, %v2414_v30  ;;  %1751 = vmatmul.msk.bf16.gmra.mxu1 %vm322_vm2, %v2414_v30  ;;  %v1621_v14 = vor.u32 %v2089_v10, %v1618_v11  ;;  %v1821_v19 = vor.u32 %v2139_v18, %v1820_v16  ;;  %v1812_v20 = vld [vmem:[#allocation5 + $0x60] sm:$0xf]  ;;  %v2137_v21 = vld [vmem:[#allocation5 + $0x64] sm:$0xf0]  ;;  %v1884_v23 = vld [vmem:[#allocation5 + $0xf0] sm:$0xf] }
  0x2b   :  { %448 = vmatpush.bf16.msrb.mxu1 %v1665_v36  ;;  %v1813_v22 = vor.u32 %v2137_v21, %v1812_v20  ;;  %v2155_v24 = vld [vmem:[#allocation5 + $0xf4] sm:$0xf0]  ;;  %v1804_v25 = vld [vmem:[#allocation5 + $0x50] sm:$0xf]  ;;  %v1876_v28 = vld [vmem:[#allocation5 + $0xe0] sm:$0xf] }
  0x2c   :  { %355 = vmatpush.bf16.msra.mxu0 %v1609_v26  ;;  %v2135_v26 = vld [vmem:[#allocation5 + $0x54] sm:$0xf0]  ;;  %v2153_v29 = vld [vmem:[#allocation5 + $0xe4] sm:$0xf0]  ;;  %v1788_v37 = vld [vmem:[#allocation5 + $0x30] sm:$0xf] }
  0x2d   :  { %403 = vmatpush.bf16.msra.mxu2 %v1613_v31  ;;  %v1805_v27 = vor.u32 %v2135_v26, %v1804_v25  ;;  %v1796_v31 = vld [vmem:[#allocation5 + $0x40] sm:$0xf]  ;;  %v2133_v32 = vld [vmem:[#allocation5 + $0x44] sm:$0xf0]  ;;  %v2131_v38 = vld [vmem:[#allocation5 + $0x34] sm:$0xf0] }
  0x2e   :  { %v1797_v33 = vor.u32 %v2133_v32, %v1796_v31  ;;  %v1860_v40 = vld [vmem:[#allocation5 + $0xc0] sm:$0xf]  ;;  %v2149_v42 = vld [vmem:[#allocation5 + $0xc4] sm:$0xf0]  ;;  %v2147_v47 = vld [vmem:[#allocation5 + $0xb4] sm:$0xf0] }
  0x2f   :  { %356 = vmatmul.bf16.vlgmr.msra.gmra.mxu0 %v2417_v35  ;;  %449 = vmatpush.bf16.msrb.mxu1 %v1649_v45  ;;  %v1861_v43 = vor.u32 %v2149_v42, %v1860_v40  ;;  %v1780_v44 = vld [vmem:[#allocation5 + $0x20] sm:$0xf]  ;;  %v1772_v49 = vld [vmem:[#allocation5 + $0x10] sm:$0xf]  ;;  %v2127_v50 = vld [vmem:[#allocation5 + $0x14] sm:$0xf0] }
  0x30   :  { %404 = vmatmul.bf16.vlgmr.msra.gmra.mxu2 %v2417_v35  ;;  %492 = vmatpush.bf16.msrb.mxu0 %v1733_v39  ;;  %v1789_v39 = vor.u32 %v2131_v38, %v1788_v37  ;;  %v2145_v53 = vld [vmem:[#allocation5 + $0xa4] sm:$0xf0]  ;;  %v1764_v55 = vld [vmem:[#allocation5] sm:$0xf]  ;;  %v2143_v60 = vld [vmem:[#allocation5 + $0x94] sm:$0xf0] }
  0x31   :  { %522 = vmatpush.bf16.msrb.mxu2 %v346_v34  ;;  %v1868_v34 = vld [vmem:[#allocation5 + $0xd0] sm:$0xf]  ;;  %v2125_v56 = vld [vmem:[#allocation5 + $0x4] sm:$0xf0]  ;;  %v1828_v1 = vld [vmem:[#allocation5 + $0x80] sm:$0xf] }
  0x32   :  { %v1765_v57 = vor.u32 %v2125_v56, %v1764_v55  ;;  %v1940_v5 = vld [vmem:[#allocation5 + $0x160] sm:$0xf]  ;;  %v2012_v7 = vld [vmem:[#allocation5 + $0x1f0] sm:$0xf]  ;;  %v2187_v8 = vld [vmem:[#allocation5 + $0x1f4] sm:$0xf0] }
  0x33   :  { %450 = vmatpush.bf16.msrb.mxu1 %v1633_v51  ;;  %v1773_v51 = vor.u32 %v2127_v50, %v1772_v49  ;;  %v2013_v11 = vor.u32 %v2187_v8, %v2012_v7  ;;  %v1932_v12 = vld [vmem:[#allocation5 + $0x150] sm:$0xf]  ;;  %v2167_v13 = vld [vmem:[#allocation5 + $0x154] sm:$0xf0]  ;;  %v2004_v18 = vld [vmem:[#allocation5 + $0x1e0] sm:$0xf] }
  0x34   :  { %493 = vmatpush.bf16.msrb.mxu0 %v1717_v46  ;;  %v1852_v46 = vld [vmem:[#allocation5 + $0xb0] sm:$0xf]  ;;  %v1924_v20 = vld [vmem:[#allocation5 + $0x140] sm:$0xf]  ;;  %v2161_v38 = vld [vmem:[#allocation5 + $0x124] sm:$0xf0] }
  0x35   :  { %523 = vmatpush.bf16.msrb.mxu2 %v1749_v17  ;;  %v2129_v17 = vld [vmem:[#allocation5 + $0x24] sm:$0xf0]  ;;  %v1853_v48 = vor.u32 %v2147_v47, %v1852_v46  ;;  %v2466_v16 = vld [vmem:[%s2642_s2] sm:$0xf]  ;;  %v1908_v37 = vld [vmem:[#allocation5 + $0x120] sm:$0xf] }
  0x36   :  { %v1781_v45 = vor.u32 %v2129_v17, %v1780_v44  ;;  %v1916_v26 = vld [vmem:[#allocation5 + $0x130] sm:$0xf]  ;;  %v1814_v44 = vld [vmem:[#allocation5 + $0x68] sm:$0xf0]  ;;  %v2154_v17 = vld [vmem:[#allocation5 + $0xf4] sm:$0xf] }
  0x37   :  { %451 = vmatpush.bf16.msrb.mxu1 %v1617_v59  ;;  %v1836_v59 = vld [vmem:[#allocation5 + $0x90] sm:$0xf]  ;;  %v2479_v46 = vperm.slane %v2466_v16, 1  ;;  %v1806_v56 = vld [vmem:[#allocation5 + $0x58] sm:$0xf0] }
  0x38   :  { %494 = vmatpush.bf16.msrb.mxu0 %v1701_v52  ;;  %v1844_v52 = vld [vmem:[#allocation5 + $0xa0] sm:$0xf]  ;;  %v1837_v61 = vor.u32 %v2143_v60, %v1836_v59  ;;  %v2152_v60 = vld [vmem:[#allocation5 + $0xe4] sm:$0xf]  ;;  %v2157_v7 = vld [vmem:[#allocation5 + $0x104] sm:$0xf0] }
  0x39   :  { %v1845_v54 = vor.u32 %v2145_v53, %v1844_v52  ;;  %1038 = vmatpush.bf16.msra.mxu2 %v2013_v11  ;;  %v1900_v52 = vld [vmem:[#allocation5 + $0x110] sm:$0xf]  ;;  %v2159_v53 = vld [vmem:[#allocation5 + $0x114] sm:$0xf0] }
  0x3a   :  { %1755 = vmatmul.msk.bf16.gmra.mxu3 %vm322_vm2, %v83_v63  ;;  %1752 = vmatmul.msk.bf16.gmra.mxu1 %vm322_vm2, %v83_v63  ;;  %v1901_v55 = vor.u32 %v2159_v53, %v1900_v52 }
  0x3b   :  { %966 = vmatpush.bf16.msra.mxu1 %v1821_v19  ;;  %v2185_v19 = vld [vmem:[#allocation5 + $0x1e4] sm:$0xf0] }
  0x3c   :  { %495 = vmatpush.bf16.msrb.mxu0 %v1685_v62  ;;  %v1948_v62 = vld [vmem:[#allocation5 + $0x170] sm:$0xf]  ;;  %v2005_v21 = vor.u32 %v2185_v19, %v2004_v18  ;;  %v2150_v18 = vld [vmem:[#allocation5 + $0xd4] sm:$0xf]  ;;  %v1870_v19 = vld [vmem:[#allocation5 + $0xd8] sm:$0xf0] }
  0x3e   :  { %1039 = vmatpush.bf16.msra.mxu2 %v2005_v21 }
  0x3f   :  { %361 = vmatmul.bf16.gmra.mxu0 %v80_v2  ;;  %967 = vmatpush.bf16.msra.mxu1 %v1813_v22  ;;  %v2165_v22 = vld [vmem:[#allocation5 + $0x144] sm:$0xf0] }
  0x40   :  { %409 = vmatmul.bf16.gmra.mxu2 %v80_v2  ;;  %496 = vmatpush.bf16.msrb.mxu0 %v1669_v3 }
  0x43   :  { %968 = vmatpush.bf16.msra.mxu1 %v1805_v27  ;;  %v2163_v27 = vld [vmem:[#allocation5 + $0x134] sm:$0xf0] }
  0x44   :  { %497 = vmatpush.bf16.msrb.mxu0 %v1653_v6  ;;  %v2169_v6 = vld [vmem:[#allocation5 + $0x164] sm:$0xf0] }
  0x47   :  { %969 = vmatpush.bf16.msra.mxu1 %v1797_v33 }
  0x48   :  { %498 = vmatpush.bf16.msrb.mxu0 %v1637_v9  ;;  %v1941_v9 = vor.u32 %v2169_v6, %v1940_v5  ;;  %v1892_v6 = vld [vmem:[#allocation5 + $0x100] sm:$0xf] }
  0x49   :  { %v1893_v8 = vor.u32 %v2157_v7, %v1892_v6  ;;  %v2124_v6 = vld [vmem:[#allocation5 + $0x4] sm:$0xf]  ;;  %v1766_v7 = vld [vmem:[#allocation5 + $0x8] sm:$0xf0] }
  0x4a   :  { %1756 = vmatmul.msk.bf16.vlgmr.msrb.gmra.mxu3 %vm322_vm2, %v2395_v41  ;;  %452 = vmatmul.bf16.vlgmr.msrb.gmra.mxu1 %v2417_v35 }
  0x4b   :  { %970 = vmatpush.bf16.msra.mxu1 %v1789_v39  ;;  %v2136_v39 = vld [vmem:[#allocation5 + $0x64] sm:$0xf] }
  0x4c   :  { %499 = vmatpush.bf16.msrb.mxu0 %v1621_v14  ;;  %v1933_v14 = vor.u32 %v2167_v13, %v1932_v12 }
  0x4f   :  { %366 = vmatmul.bf16.gmra.mxu0 %v82_v15  ;;  %971 = vmatpush.bf16.msra.mxu1 %v1781_v45  ;;  %v1886_v45 = vld [vmem:[#allocation5 + $0xf8] sm:$0xf0] }
  0x50   :  { %414 = vmatmul.bf16.gmra.mxu2 %v82_v15  ;;  %v1889_v49 = vor.u32 %v2154_v17, %v1886_v45  ;;  %v1972_v45 = vld [vmem:[#allocation5 + $0x1a0] sm:$0xf] }
  0x53   :  { %972 = vmatpush.bf16.msra.mxu1 %v1773_v51 }
  0x57   :  { %973 = vmatpush.bf16.msra.mxu1 %v1765_v57 }
  0x5a   :  { %1757 = vmatmul.msk.bf16.gmra.mxu3 %vm322_vm2, %v2414_v30  ;;  %457 = vmatmul.bf16.gmra.mxu1 %v80_v2 }
  0x5f   :  { %500 = vmatmul.bf16.vlgmr.msrb.gmra.mxu0 %v2417_v35  ;;  %v2151_v35 = vld [vmem:[#allocation5 + $0xd4] sm:$0xf0] }
  0x60   :  { %1759 = vmatmul.msk.bf16.vlgmr.msrb.gmra.mxu2 %vm322_vm2, %v2395_v41  ;;  %v1885_v41 = vor.u32 %v2155_v24, %v1884_v23  ;;  %v1869_v36 = vor.u32 %v2151_v35, %v1868_v34  ;;  %v1925_v24 = vor.u32 %v2165_v22, %v1924_v20  ;;  %v1996_v34 = vld [vmem:[#allocation5 + $0x1d0] sm:$0xf]  ;;  %v2183_v35 = vld [vmem:[#allocation5 + $0x1d4] sm:$0xf0] }
  0x62   :  { %990 = vmatpush.bf16.msra.mxu3 %v1885_v41  ;;  %v2471_v41 = vperm.slane %v2466_v16, 0 }
  0x6a   :  { %1758 = vmatmul.msk.bf16.gmra.mxu3 %vm322_vm2, %v83_v63  ;;  %462 = vmatmul.bf16.gmra.mxu1 %v82_v15 }
  0x6f   :  { %505 = vmatmul.bf16.gmra.mxu0 %v80_v2  ;;  %v2141_v2 = vld [vmem:[#allocation5 + $0x84] sm:$0xf0] }
  0x70   :  { %1760 = vmatmul.msk.bf16.gmra.mxu2 %vm322_vm2, %v2414_v30  ;;  %v1877_v30 = vor.u32 %v2153_v29, %v1876_v28  ;;  %v1829_v4 = vor.u32 %v2141_v2, %v1828_v1  ;;  %v2138_v28 = vld [vmem:[#allocation5 + $0x74] sm:$0xf]  ;;  %v1917_v29 = vor.u32 %v2163_v27, %v1916_v26  ;;  %v2179_v26 = vld [vmem:[#allocation5 + $0x1b4] sm:$0xf0] }
  0x71   :  { %v2130_v27 = vld [vmem:[#allocation5 + $0x34] sm:$0xf] }
  0x72   :  { %991 = vmatpush.bf16.msra.mxu3 %v1877_v30  ;;  %v1822_v30 = vld [vmem:[#allocation5 + $0x78] sm:$0xf0] }
  0x73   :  { %v1825_v31 = vor.u32 %v2138_v28, %v1822_v30  ;;  %v1790_v30 = vld [vmem:[#allocation5 + $0x38] sm:$0xf0] }
  0x75   :  { %1062 = vmatpush.bf16.msrb.mxu1 %v1825_v31  ;;  %v1793_v31 = vor.u32 %v2130_v27, %v1790_v30 }
  0x76   :  { %992 = vmatpush.bf16.msra.mxu3 %v1869_v36  ;;  %v1997_v36 = vor.u32 %v2183_v35, %v1996_v34  ;;  %v1862_v34 = vld [vmem:[#allocation5 + $0xc8] sm:$0xf0] }
  0x78   :  { %1040 = vmatpush.bf16.msra.mxu2 %v1997_v36 }
  0x7a   :  { %993 = vmatpush.bf16.msra.mxu3 %v1861_v43  ;;  %v1909_v43 = vor.u32 %v2161_v38, %v1908_v37 }
  0x7e   :  { %994 = vmatpush.bf16.msra.mxu3 %v1853_v48  ;;  %v1817_v48 = vor.u32 %v2136_v39, %v1814_v44  ;;  %v2128_v39 = vld [vmem:[#allocation5 + $0x24] sm:$0xf] }
  0x7f   :  { %510 = vmatmul.bf16.gmra.mxu0 %v82_v15 }
  0x80   :  { %1761 = vmatmul.msk.bf16.gmra.mxu2 %vm322_vm2, %v83_v63  ;;  %v2171_v63 = vld [vmem:[#allocation5 + $0x174] sm:$0xf0]  ;;  %1063 = vmatpush.bf16.msrb.mxu1 %v1817_v48  ;;  %v2146_v48 = vld [vmem:[#allocation5 + $0xb4] sm:$0xf] }
  0x81   :  { %v1949_v0 = vor.u32 %v2171_v63, %v1948_v62 }
  0x82   :  { %995 = vmatpush.bf16.msra.mxu3 %v1845_v54  ;;  %v2134_v54 = vld [vmem:[#allocation5 + $0x54] sm:$0xf] }
  0x83   :  { %1014 = vmatpush.bf16.msra.mxu0 %v1949_v0  ;;  %v1809_v59 = vor.u32 %v2134_v54, %v1806_v56  ;;  %v1988_v0 = vld [vmem:[#allocation5 + $0x1c0] sm:$0xf]  ;;  %v1774_v56 = vld [vmem:[#allocation5 + $0x18] sm:$0xf0] }
  0x85   :  { %1064 = vmatpush.bf16.msrb.mxu1 %v1809_v59  ;;  %v2175_v59 = vld [vmem:[#allocation5 + $0x194] sm:$0xf0] }
  0x86   :  { %996 = vmatpush.bf16.msra.mxu3 %v1837_v61  ;;  %v1878_v61 = vld [vmem:[#allocation5 + $0xe8] sm:$0xf0] }
  0x87   :  { %1015 = vmatpush.bf16.msra.mxu0 %v1941_v9  ;;  %v1881_v1 = vor.u32 %v2152_v60, %v1878_v61  ;;  %v2132_v9 = vld [vmem:[#allocation5 + $0x44] sm:$0xf] }
  0x8a   :  { %997 = vmatpush.bf16.msra.mxu3 %v1829_v4 }
  0x8b   :  { %1016 = vmatpush.bf16.msra.mxu0 %v1933_v14 }
  0x8e   :  { %1086 = vmatpush.bf16.msrb.mxu3 %v1889_v49 }
  0x8f   :  { %1017 = vmatpush.bf16.msra.mxu0 %v1925_v24  ;;  %v1873_v24 = vor.u32 %v2150_v18, %v1870_v19 }
  0x92   :  { %1087 = vmatpush.bf16.msrb.mxu3 %v1881_v1 }
  0x93   :  { %1018 = vmatpush.bf16.msra.mxu0 %v1917_v29 }
  0x96   :  { %1088 = vmatpush.bf16.msrb.mxu3 %v1873_v24  ;;  %v1956_v24 = vld [vmem:[#allocation5 + $0x180] sm:$0xf] }
  0x97   :  { %v2457_v58 = vpop.f32.mrf.mxu1  ;;  %1019 = vmatpush.bf16.msra.mxu0 %v1909_v43 }
  0x9b   :  { %1020 = vmatpush.bf16.msra.mxu0 %v1901_v55  ;;  %v2126_v55 = vld [vmem:[#allocation5 + $0x14] sm:$0xf] }
  0x9c   :  { %v1777_v60 = vor.u32 %v2126_v55, %v1774_v56  ;;  %v2166_v55 = vld [vmem:[#allocation5 + $0x154] sm:$0xf]  ;;  %v1934_v56 = vld [vmem:[#allocation5 + $0x158] sm:$0xf0] }
  0x9d   :  { %v2459_v3 = vpop.f32.mrf.mxu3 }
  0x9f   :  { %v383_v10 = vpop.f32.mrf.mxu1  ;;  %1021 = vmatpush.bf16.msra.mxu0 %v1893_v8  ;;  %v1769_v8 = vor.u32 %v2124_v6, %v1766_v7 }
  0xa5   :  { %v2461_v15 = vpop.f32.mrf.mxu3 }
  0xa7   :  { %v2468_v23 = vpop.f32.mrf.mxu1 }
  0xac   :  { %v357_v25 = vpop.f32.mrf.mxu0 }
  0xad   :  { %v2473_v32 = vpop.f32.mrf.mxu3  ;;  %v358_v33 = vadd.f32 %v357_v25, %v2471_v41  ;;  %v1980_v25 = vld [vmem:[#allocation5 + $0x1b0] sm:$0xf] }
  0xae   :  { %v1981_v29 = vor.u32 %v2179_v26, %v1980_v25  ;;  %v2173_v25 = vld [vmem:[#allocation5 + $0x184] sm:$0xf0]  ;;  %v2170_v26 = vld [vmem:[#allocation5 + $0x174] sm:$0xf] }
  0xaf   :  { %v2476_v42 = vpop.f32.mrf.mxu1  ;;  %v382_v50 = vadd.f32 %v2457_v58, %v358_v33  ;;  %v2181_v58 = vld [vmem:[#allocation5 + $0x1c4] sm:$0xf0]  ;;  %v2148_v33 = vld [vmem:[#allocation5 + $0xc4] sm:$0xf] }
  0xb0   :  { %v1989_v5 = vor.u32 %v2181_v58, %v1988_v0  ;;  %v1865_v37 = vor.u32 %v2148_v33, %v1862_v34  ;;  %v2144_v0 = vld [vmem:[#allocation5 + $0xa4] sm:$0xf]  ;;  %v1846_v58 = vld [vmem:[#allocation5 + $0xa8] sm:$0xf0] }
  0xb1   :  { %v540_v2 = vmax.f32 %v382_v50, 0.0 }
  0xb2   :  { %1041 = vmatpush.bf16.msra.mxu2 %v1989_v5  ;;  %1089 = vmatpush.bf16.msrb.mxu3 %v1865_v37 }
  0xb3   :  { %v405_v40 = vpop.f32.mrf.mxu2 }
  0xb4   :  { %v359_v47 = vpop.f32.mrf.mxu0  ;;  %v406_v62 = vadd.f32 %v405_v40, %v2479_v46  ;;  %v1782_v40 = vld [vmem:[#allocation5 + $0x28] sm:$0xf0] }
  0xb5   :  { %v360_v51 = vadd.f32 %v359_v47, %v2471_v41  ;;  %v2484_v63 = vpop.f32.mrf.mxu3  ;;  %v2177_v47 = vld [vmem:[#allocation5 + $0x1a4] sm:$0xf0] }
  0xb6   :  { %v430_v20 = vadd.f32 %v2459_v3, %v406_v62  ;;  %1042 = vmatpush.bf16.msra.mxu2 %v1981_v29  ;;  %v1973_v50 = vor.u32 %v2177_v47, %v1972_v45  ;;  %v1950_v29 = vld [vmem:[#allocation5 + $0x178] sm:$0xf0]  ;;  %v2186_v47 = vld [vmem:[#allocation5 + $0x1f4] sm:$0xf] }
  0xb7   :  { %v384_v57 = vadd.f32 %v383_v10, %v360_v51  ;;  %v1798_v10 = vld [vmem:[#allocation5 + $0x48] sm:$0xf0]  ;;  %v2488_v13 = vpop.f32.mrf.mxu1  ;;  %v1854_v51 = vld [vmem:[#allocation5 + $0xb8] sm:$0xf0]  ;;  %v1953_v30 = vor.u32 %v2170_v26, %v1950_v29 }
  0xb8   :  { %v1801_v14 = vor.u32 %v2132_v9, %v1798_v10  ;;  %v541_v3 = vmax.f32 %v430_v20, 0.0  ;;  %v1857_v54 = vor.u32 %v2146_v48, %v1854_v51  ;;  %v2014_v48 = vld [vmem:[#allocation5 + $0x1f8] sm:$0xf0] }
  0xb9   :  { %v544_v4 = vmax.f32 %v384_v57, 0.0  ;;  %v1964_v57 = vld [vmem:[#allocation5 + $0x190] sm:$0xf]  ;;  %1110 = vmatpush.bf16.msrb.mxu0 %v1953_v30  ;;  %v2017_v51 = vor.u32 %v2186_v47, %v2014_v48  ;;  %v1998_v26 = vld [vmem:[#allocation5 + $0x1d8] sm:$0xf0] }
  0xba   :  { %1065 = vmatpush.bf16.msrb.mxu1 %v1801_v14  ;;  %1043 = vmatpush.bf16.msra.mxu2 %v1973_v50  ;;  %v1965_v62 = vor.u32 %v2175_v59, %v1964_v57  ;;  %v1838_v14 = vld [vmem:[#allocation5 + $0x98] sm:$0xf0]  ;;  %v1937_v57 = vor.u32 %v2166_v55, %v1934_v56  ;;  %v2160_v30 = vld [vmem:[#allocation5 + $0x124] sm:$0xf]  ;;  %v2178_v48 = vld [vmem:[#allocation5 + $0x1b4] sm:$0xf] }
  0xbb   :  { %v2486_v11 = vpack.c.bf16 %v544_v4, %v540_v2  ;;  %v407_v12 = vpop.f32.mrf.mxu2  ;;  %1090 = vmatpush.bf16.msrb.mxu3 %v1857_v54  ;;  %v1894_v55 = vld [vmem:[#allocation5 + $0x108] sm:$0xf0] }
  0xbc   :  { %v408_v21 = vadd.f32 %v407_v12, %v2479_v46  ;;  %v362_v22 = vpop.f32.mrf.mxu0 }
  0xbd   :  { %974 = vmatmul.bf16.vlgmr.msra.gmra.mxu1 %v2486_v11  ;;  %v2494_v36 = vpop.f32.mrf.mxu3  ;;  %v363_v38 = vadd.f32 %v362_v22, %v2471_v41 }
  0xbe   :  { %v432_v28 = vadd.f32 %v2461_v15, %v408_v21  ;;  %1066 = vmatpush.bf16.msrb.mxu1 %v1793_v31  ;;  %v1785_v15 = vor.u32 %v2128_v39, %v1782_v40  ;;  %1044 = vmatpush.bf16.msra.mxu2 %v1965_v62  ;;  %v2513_v21 = vperm.slane %v2466_v16, 2  ;;  %v1830_v31 = vld [vmem:[#allocation5 + $0x88] sm:$0xf0]  ;;  %v2168_v39 = vld [vmem:[#allocation5 + $0x164] sm:$0xf] }
  0xbf   :  { %v2499_v17 = vpop.f32.mrf.mxu1  ;;  %v387_v52 = vadd.f32 %v2468_v23, %v363_v38  ;;  %v1849_v23 = vor.u32 %v2144_v0, %v1846_v58  ;;  %v1942_v40 = vld [vmem:[#allocation5 + $0x168] sm:$0xf0] }
  0xc0   :  { %v545_v35 = vmax.f32 %v432_v28, 0.0  ;;  %v1957_v28 = vor.u32 %v2173_v25, %v1956_v24  ;;  %v2182_v25 = vld [vmem:[#allocation5 + $0x1d4] sm:$0xf] }
  0xc1   :  { %v548_v4 = vmax.f32 %v387_v52, 0.0  ;;  %1091 = vmatpush.bf16.msrb.mxu3 %v1849_v23  ;;  %v1926_v23 = vld [vmem:[#allocation5 + $0x148] sm:$0xf0] }
  0xc2   :  { %v2497_v43 = vpack.c.bf16 %v545_v35, %v541_v3  ;;  %1067 = vmatpush.bf16.msrb.mxu1 %v1785_v15  ;;  %1045 = vmatpush.bf16.msra.mxu2 %v1957_v28  ;;  %v1945_v15 = vor.u32 %v2168_v39, %v1942_v40  ;;  %v2001_v28 = vor.u32 %v2182_v25, %v1998_v26  ;;  %v2158_v39 = vld [vmem:[#allocation5 + $0x114] sm:$0xf]  ;;  %v1902_v40 = vld [vmem:[#allocation5 + $0x118] sm:$0xf0]  ;;  %v1958_v25 = vld [vmem:[#allocation5 + $0x188] sm:$0xf0] }
  0xc3   :  { %v410_v44 = vpop.f32.mrf.mxu2 }
  0xc4   :  { %998 = vmatmul.bf16.vlgmr.msra.gmra.mxu3 %v2497_v43  ;;  %v364_v49 = vpop.f32.mrf.mxu0  ;;  %v411_v1 = vadd.f32 %v410_v44, %v2479_v46  ;;  %1111 = vmatpush.bf16.msrb.mxu0 %v1945_v15 }
  0xc5   :  { %v365_v53 = vadd.f32 %v364_v49, %v2471_v41  ;;  %v2506_v2 = vpop.f32.mrf.mxu3 }
  0xc6   :  { %1068 = vmatpush.bf16.msrb.mxu1 %v1777_v60  ;;  %v435_v18 = vadd.f32 %v2473_v32, %v411_v1  ;;  %v2140_v32 = vld [vmem:[#allocation5 + $0x84] sm:$0xf]  ;;  %1134 = vmatpush.bf16.msrb.mxu2 %v2017_v51 }
  0xc7   :  { %v389_v61 = vadd.f32 %v2476_v42, %v365_v53  ;;  %v453_v10 = vpop.f32.mrf.mxu1  ;;  %v2142_v42 = vld [vmem:[#allocation5 + $0x94] sm:$0xf]  ;;  %v1833_v37 = vor.u32 %v2140_v32, %v1830_v31  ;;  %v2164_v1 = vld [vmem:[#allocation5 + $0x144] sm:$0xf]  ;;  %v1910_v32 = vld [vmem:[#allocation5 + $0x128] sm:$0xf0] }
  0xc8   :  { %v1841_v22 = vor.u32 %v2142_v42, %v1838_v14  ;;  %v549_v33 = vmax.f32 %v435_v18, 0.0  ;;  %v454_v38 = vadd.f32 %v453_v10, %v2513_v21  ;;  %1112 = vmatpush.bf16.msrb.mxu0 %v1937_v57  ;;  %v2538_v31 = vperm.slane %v2466_v16, 3  ;;  %v1990_v16 = vld [vmem:[#allocation5 + $0x1c8] sm:$0xf0] }
  0xc9   :  { %v552_v5 = vmax.f32 %v389_v61, 0.0 }
  0xca   :  { %1069 = vmatpush.bf16.msrb.mxu1 %v1769_v8  ;;  %1092 = vmatpush.bf16.msrb.mxu3 %v1841_v22  ;;  %v2184_v8 = vld [vmem:[#allocation5 + $0x1e4] sm:$0xf] }
  0xcb   :  { %v412_v9 = vpop.f32.mrf.mxu2  ;;  %v2508_v12 = vpack.c.bf16 %v552_v5, %v548_v4 }
  0xcc   :  { %v413_v19 = vadd.f32 %v412_v9, %v2479_v46  ;;  %v367_v20 = vpop.f32.mrf.mxu0  ;;  %v2006_v9 = vld [vmem:[#allocation5 + $0x1e8] sm:$0xf0] }
  0xcd   :  { %979 = vmatmul.bf16.gmra.mxu1 %v2508_v12  ;;  %v368_v3 = vadd.f32 %v367_v20, %v2471_v41  ;;  %v477_v35 = vpop.f32.mrf.mxu3  ;;  %v2009_v14 = vor.u32 %v2184_v8, %v2006_v9  ;;  %v1918_v20 = vld [vmem:[#allocation5 + $0x138] sm:$0xf0] }
  0xce   :  { %v437_v27 = vadd.f32 %v2484_v63, %v413_v19  ;;  %1093 = vmatpush.bf16.msrb.mxu3 %v1833_v37  ;;  %v478_v52 = vadd.f32 %v477_v35, %v454_v38  ;;  %v2162_v19 = vld [vmem:[#allocation5 + $0x134] sm:$0xf] }
  0xcf   :  { %v455_v45 = vpop.f32.mrf.mxu1  ;;  %v392_v49 = vadd.f32 %v2488_v13, %v368_v3  ;;  %1135 = vmatpush.bf16.msrb.mxu2 %v2009_v14  ;;  %v1921_v24 = vor.u32 %v2162_v19, %v1918_v20  ;;  %v1966_v14 = vld [vmem:[#allocation5 + $0x198] sm:$0xf0]  ;;  %v2172_v19 = vld [vmem:[#allocation5 + $0x184] sm:$0xf] }
  0xd0   :  { %v553_v34 = vmax.f32 %v437_v27, 0.0  ;;  %v456_v54 = vadd.f32 %v455_v45, %v2513_v21  ;;  %v542_v62 = vmax.f32 %v478_v52, 0.0  ;;  %v1905_v45 = vor.u32 %v2158_v39, %v1902_v40 }
  0xd1   :  { %v556_v60 = vmax.f32 %v392_v49, 0.0  ;;  %v1982_v49 = vld [vmem:[#allocation5 + $0x1b8] sm:$0xf0] }
  0xd2   :  { %v2519_v63 = vpack.c.bf16 %v553_v34, %v549_v33 }
  0xd3   :  { %v415_v44 = vpop.f32.mrf.mxu2  ;;  %1136 = vmatpush.bf16.msrb.mxu2 %v2001_v28 }
  0xd4   :  { %1003 = vmatmul.bf16.gmra.mxu3 %v2519_v63  ;;  %v369_v50 = vpop.f32.mrf.mxu0  ;;  %v416_v61 = vadd.f32 %v415_v44, %v2479_v46  ;;  %v2180_v44 = vld [vmem:[#allocation5 + $0x1c4] sm:$0xf] }
  0xd5   :  { %v370_v53 = vadd.f32 %v369_v50, %v2471_v41  ;;  %v479_v13 = vpop.f32.mrf.mxu3  ;;  %v1929_v41 = vor.u32 %v2164_v1, %v1926_v23  ;;  %v1993_v47 = vor.u32 %v2180_v44, %v1990_v16 }
  0xd6   :  { %v480_v58 = vadd.f32 %v479_v13, %v456_v54  ;;  %v2156_v54 = vld [vmem:[#allocation5 + $0x104] sm:$0xf] }
  0xd7   :  { %v394_v59 = vadd.f32 %v2499_v17, %v370_v53  ;;  %v458_v6 = vpop.f32.mrf.mxu1  ;;  %v440_v17 = vadd.f32 %v2494_v36, %v416_v61  ;;  %1113 = vmatpush.bf16.msrb.mxu0 %v1929_v41  ;;  %1137 = vmatpush.bf16.msrb.mxu2 %v1993_v47  ;;  %v1985_v53 = vor.u32 %v2178_v48, %v1982_v49  ;;  %v2176_v41 = vld [vmem:[#allocation5 + $0x1a4] sm:$0xf] }
  0xd8   :  { %v546_v4 = vmax.f32 %v480_v58, 0.0  ;;  %v459_v29 = vadd.f32 %v458_v6, %v2513_v21 }
  0xd9   :  { %v560_v0 = vmax.f32 %v394_v59, 0.0  ;;  %v557_v36 = vmax.f32 %v440_v17, 0.0  ;;  %v1897_v59 = vor.u32 %v2156_v54, %v1894_v55  ;;  %v2188_v54 = vld [vmem:[%s2645_s5] sm:$0xff] }
  0xda   :  { %v2531_v18 = vpack.c.bf16 %v546_v4, %v542_v62  ;;  %v1974_v4 = vld [vmem:[#allocation5 + $0x1a8] sm:$0xf0] }
  0xdb   :  { %v417_v5 = vpop.f32.mrf.mxu2  ;;  %v2527_v7 = vpack.c.bf16 %v560_v0, %v556_v60  ;;  %1114 = vmatpush.bf16.msrb.mxu0 %v1921_v24  ;;  %1138 = vmatpush.bf16.msrb.mxu2 %v1985_v53  ;;  %v1977_v8 = vor.u32 %v2176_v41, %v1974_v4  ;;  %v2189_v53 = vld [vmem:[%s2645_s5 + $0x8] sm:$0xff] }
  0xdc   :  { %v418_v10 = vadd.f32 %v417_v5, %v2479_v46  ;;  %v501_v42 = vpop.f32.mrf.mxu0  ;;  %1022 = vmatmul.bf16.vlgmr.msra.gmra.mxu0 %v2531_v18 }
  0xdd   :  { %984 = vmatmul.bf16.gmra.mxu1 %v2527_v7  ;;  %v482_v46 = vpop.f32.mrf.mxu3  ;;  %v502_v15 = vadd.f32 %v501_v42, %v2538_v31 }
  0xde   :  { %v442_v22 = vadd.f32 %v2506_v2, %v418_v10  ;;  %v1913_v2 = vor.u32 %v2160_v30, %v1910_v32  ;;  %v483_v37 = vadd.f32 %v482_v46, %v459_v29 }
  0xdf   :  { %v460_v3 = vpop.f32.mrf.mxu1  ;;  %1139 = vmatpush.bf16.msrb.mxu2 %v1977_v8 }
  0xe0   :  { %v561_v27 = vmax.f32 %v442_v22, 0.0  ;;  %v461_v38 = vadd.f32 %v460_v3, %v2513_v21  ;;  %1115 = vmatpush.bf16.msrb.mxu0 %v1913_v2  ;;  %v550_v51 = vmax.f32 %v483_v37, 0.0 }
  0xe2   :  { %v2540_v33 = vpack.c.bf16 %v561_v27, %v557_v36  ;;  %v1961_v36 = vor.u32 %v2172_v19, %v1958_v25 }
  0xe3   :  { %v525_v34 = vpop.f32.mrf.mxu2 }
  0xe4   :  { %1008 = vmatmul.bf16.gmra.mxu3 %v2540_v33  ;;  %v503_v35 = vpop.f32.mrf.mxu0  ;;  %1116 = vmatpush.bf16.msrb.mxu0 %v1905_v45  ;;  %v526_v56 = vadd.f32 %v525_v34, %v502_v15 }
  0xe5   :  { %v484_v50 = vpop.f32.mrf.mxu3  ;;  %v504_v57 = vadd.f32 %v503_v35, %v2538_v31 }
  0xe6   :  { %v485_v52 = vadd.f32 %v484_v50, %v461_v38  ;;  %v543_v1 = vmax.f32 %v526_v56, 0.0  ;;  %v2190_v50 = vld [vmem:[%s2645_s5 + $0x10] sm:$0xff] }
  0xe7   :  { %v463_v13 = vpop.f32.mrf.mxu1 }
  0xe8   :  { %v554_v60 = vmax.f32 %v485_v52, 0.0  ;;  %1117 = vmatpush.bf16.msrb.mxu0 %v1897_v59  ;;  %v464_v9 = vadd.f32 %v463_v13, %v2513_v21  ;;  %v2203_v59 = vld [vmem:[%s2645_s5 + $0x78] sm:$0xff] }
  0xe9   :  { %1332 = vmatpush.bf16.msra.mxu3 %v2203_v59 }
  0xea   :  { %v570_v58 = vpack.c.bf16 %v554_v60, %v550_v51  ;;  %v2202_v60 = vld [vmem:[%s2645_s5 + $0x70] sm:$0xff] }
  0xeb   :  { %v527_v61 = vpop.f32.mrf.mxu2 }
  0xec   :  { %v528_v62 = vadd.f32 %v527_v61, %v504_v57  ;;  %v506_v0 = vpop.f32.mrf.mxu0  ;;  %1027 = vmatmul.bf16.gmra.mxu0 %v570_v58 }
  0xed   :  { %1070 = vmatmul.bf16.vlgmr.msrb.gmra.mxu1 %v2486_v11  ;;  %v487_v6 = vpop.f32.mrf.mxu3  ;;  %v2174_v11 = vld [vmem:[#allocation5 + $0x194] sm:$0xf]  ;;  %v507_v26 = vadd.f32 %v506_v0, %v2538_v31  ;;  %1333 = vmatpush.bf16.msra.mxu3 %v2202_v60 }
  0xee   :  { %v547_v23 = vmax.f32 %v528_v62, 0.0  ;;  %v488_v20 = vadd.f32 %v487_v6, %v464_v9  ;;  %v1969_v24 = vor.u32 %v2174_v11, %v1966_v14  ;;  %v2592_v62 = vld [vmem:[%s2644_s4] sm:$0x3] }
  0xef   :  { %v465_v10 = vpop.f32.mrf.mxu1  ;;  %v2200_v9 = vld [vmem:[%s2645_s5 + $0x60] sm:$0xff] }
  0xf0   :  { %v567_v5 = vpack.c.bf16 %v547_v23, %v543_v1  ;;  %v466_v22 = vadd.f32 %v465_v10, %v2513_v21  ;;  %1140 = vmatpush.bf16.msrb.mxu2 %v1969_v24  ;;  %v558_v46 = vmax.f32 %v488_v20, 0.0  ;;  %v2201_v1 = vld [vmem:[%s2645_s5 + $0x68] sm:$0xff]  ;;  %v2199_v20 = vld [vmem:[%s2645_s5 + $0x58] sm:$0xff] }
  0xf1   :  { %1334 = vmatpush.bf16.msra.mxu3 %v2201_v1 }
  0xf2   :  { %1046 = vmatmul.bf16.vlgmr.msra.gmra.mxu2 %v567_v5 }
  0xf3   :  { %v530_v17 = vpop.f32.mrf.mxu2 }
  0xf4   :  { %1094 = vmatmul.bf16.vlgmr.msrb.gmra.mxu3 %v2497_v43  ;;  %v508_v42 = vpop.f32.mrf.mxu0  ;;  %v531_v29 = vadd.f32 %v530_v17, %v507_v26  ;;  %1141 = vmatpush.bf16.msrb.mxu2 %v1961_v36 }
  0xf5   :  { %v489_v27 = vpop.f32.mrf.mxu3  ;;  %v509_v30 = vadd.f32 %v508_v42, %v2538_v31  ;;  %1335 = vmatpush.bf16.msra.mxu3 %v2200_v9 }
  0xf6   :  { %v490_v28 = vadd.f32 %v489_v27, %v466_v22  ;;  %v551_v21 = vmax.f32 %v531_v29, 0.0 }
  0xf8   :  { %v562_v43 = vmax.f32 %v490_v28, 0.0 }
  0xf9   :  { %1336 = vmatpush.bf16.msra.mxu3 %v2199_v20 }
  0xfa   :  { %v574_v3 = vpack.c.bf16 %v562_v43, %v558_v46  ;;  %v2198_v46 = vld [vmem:[%s2645_s5 + $0x50] sm:$0xff] }
  0xfb   :  { %v532_v32 = vpop.f32.mrf.mxu2 }
  0xfc   :  { %v533_v2 = vadd.f32 %v532_v32, %v509_v30  ;;  %v511_v34 = vpop.f32.mrf.mxu0  ;;  %1032 = vmatmul.bf16.gmra.mxu0 %v574_v3 }
  0xfd   :  { %1075 = vmatmul.bf16.gmra.mxu1 %v2508_v12  ;;  %v512_v39 = vadd.f32 %v511_v34, %v2538_v31  ;;  %1337 = vmatpush.bf16.msra.mxu3 %v2198_v46 }
  0xfe   :  { %v555_v35 = vmax.f32 %v533_v2, 0.0  ;;  %v2197_v2 = vld [vmem:[%s2645_s5 + $0x48] sm:$0xff] }
 0x100   :  { %v571_v37 = vpack.c.bf16 %v555_v35, %v551_v21 }
 0x101   :  { %1338 = vmatpush.bf16.msra.mxu3 %v2197_v2 }
 0x102   :  { %1051 = vmatmul.bf16.gmra.mxu2 %v571_v37 }
 0x103   :  { %v535_v38 = vpop.f32.mrf.mxu2 }
 0x104   :  { %1099 = vmatmul.bf16.gmra.mxu3 %v2519_v63  ;;  %v513_v40 = vpop.f32.mrf.mxu0  ;;  %v536_v15 = vadd.f32 %v535_v38, %v512_v39  ;;  %v2195_v63 = vld [vmem:[%s2645_s5 + $0x38] sm:$0xff] }
 0x105   :  { %v514_v44 = vadd.f32 %v513_v40, %v2538_v31  ;;  %1308 = vmatpush.bf16.msra.mxu1 %v2195_v63  ;;  %v2192_v31 = vld [vmem:[%s2645_s5 + $0x20] sm:$0xff] }
 0x106   :  { %v559_v47 = vmax.f32 %v536_v15, 0.0 }
 0x10b   :  { %v537_v16 = vpop.f32.mrf.mxu2 }
 0x10c   :  { %v538_v45 = vadd.f32 %v537_v16, %v514_v44  ;;  %1118 = vmatmul.bf16.vlgmr.msrb.gmra.mxu0 %v2531_v18  ;;  %v2193_v18 = vld [vmem:[%s2645_s5 + $0x28] sm:$0xff] }
 0x10d   :  { %1080 = vmatmul.bf16.gmra.mxu1 %v2527_v7  ;;  %v2194_v7 = vld [vmem:[%s2645_s5 + $0x30] sm:$0xff] }
 0x10e   :  { %v563_v12 = vmax.f32 %v538_v45, 0.0  ;;  %1309 = vmatpush.bf16.msra.mxu1 %v2194_v7  ;;  %v2196_v45 = vld [vmem:[%s2645_s5 + $0x40] sm:$0xff] }
 0x10f   :  { %1339 = vmatpush.bf16.msra.mxu3 %v2196_v45 }
 0x110   :  { %v575_v48 = vpack.c.bf16 %v563_v12, %v559_v47 }
 0x112   :  { %1056 = vmatmul.bf16.gmra.mxu2 %v575_v48  ;;  %1310 = vmatpush.bf16.msra.mxu1 %v2193_v18 }
 0x114   :  { %1104 = vmatmul.bf16.gmra.mxu3 %v2540_v33  ;;  %v2191_v33 = vld [vmem:[%s2645_s5 + $0x18] sm:$0xff] }
 0x116   :  { %1311 = vmatpush.bf16.msra.mxu1 %v2192_v31 }
 0x11a   :  { %1312 = vmatpush.bf16.msra.mxu1 %v2191_v33 }
 0x11c   :  { %1123 = vmatmul.bf16.gmra.mxu0 %v570_v58  ;;  %v642_v58 = vperm.slane %v2592_v62, 0 }
 0x11e   :  { %1313 = vmatpush.bf16.msra.mxu1 %v2190_v50 }
 0x122   :  { %1142 = vmatmul.bf16.vlgmr.msrb.gmra.mxu2 %v567_v5  ;;  %1314 = vmatpush.bf16.msra.mxu1 %v2189_v53 }
 0x126   :  { %1315 = vmatpush.bf16.msra.mxu1 %v2188_v54 }
 0x12c   :  { %1128 = vmatmul.bf16.gmra.mxu0 %v574_v3 }
 0x132   :  { %1147 = vmatmul.bf16.gmra.mxu2 %v571_v37 }
 0x13a   :  { %v975_v49 = vpop.f32.mrf.mxu1 }
 0x13b   :  { %v976_v4 = vadd.f32 %v975_v49, %v642_v58 }
 0x142   :  { %1152 = vmatmul.bf16.gmra.mxu2 %v575_v48  ;;  %v977_v55 = vpop.f32.mrf.mxu1 }
 0x143   :  { %v978_v6 = vadd.f32 %v977_v55, %v642_v58 }
 0x147   :  { %v999_v51 = vpop.f32.mrf.mxu3 }
 0x148   :  { %v1000_v8 = vadd.f32 %v999_v51, %v976_v4 }
 0x14a   :  { %v980_v61 = vpop.f32.mrf.mxu1 }
 0x14b   :  { %v981_v30 = vadd.f32 %v980_v61, %v642_v58  ;;  %v643_v61 = vperm.slane %v2592_v62, 1 }
 0x14f   :  { %v1001_v56 = vpop.f32.mrf.mxu3 }
 0x150   :  { %v1002_v10 = vadd.f32 %v1001_v56, %v978_v6 }
 0x152   :  { %v982_v23 = vpop.f32.mrf.mxu1 }
 0x153   :  { %v983_v43 = vadd.f32 %v982_v23, %v642_v58 }
 0x157   :  { %v1004_v13 = vpop.f32.mrf.mxu3 }
 0x158   :  { %v1005_v32 = vadd.f32 %v1004_v13, %v981_v30 }
 0x159   :  { %v1023_v52 = vpop.f32.mrf.mxu0 }
 0x15a   :  { %v1024_v42 = vadd.f32 %v1023_v52, %v1000_v8  ;;  %v985_v24 = vpop.f32.mrf.mxu1 }
 0x15b   :  { %v986_v7 = vadd.f32 %v985_v24, %v642_v58 }
 0x15f   :  { %v1006_v5 = vpop.f32.mrf.mxu3 }
 0x160   :  { %v1007_v3 = vadd.f32 %v1006_v5, %v983_v43 }
 0x161   :  { %v1025_v57 = vpop.f32.mrf.mxu0 }
 0x162   :  { %v1026_v11 = vadd.f32 %v1025_v57, %v1002_v10  ;;  %v987_v34 = vpop.f32.mrf.mxu1 }
 0x163   :  { %v988_v31 = vadd.f32 %v987_v34, %v642_v58 }
 0x167   :  { %v1009_v36 = vpop.f32.mrf.mxu3 }
 0x168   :  { %v1010_v33 = vadd.f32 %v1009_v36, %v986_v7 }
 0x169   :  { %v1028_v0 = vpop.f32.mrf.mxu0 }
 0x16a   :  { %v1029_v21 = vadd.f32 %v1028_v0, %v1005_v32  ;;  %v1071_v12 = vpop.f32.mrf.mxu1 }
 0x16b   :  { %v1072_v1 = vadd.f32 %v1071_v12, %v643_v61 }
 0x16f   :  { %v1011_v35 = vpop.f32.mrf.mxu3 }
 0x170   :  { %v1012_v49 = vadd.f32 %v1011_v35, %v988_v31 }
 0x171   :  { %v1030_v17 = vpop.f32.mrf.mxu0 }
 0x172   :  { %v1031_v37 = vadd.f32 %v1030_v17, %v1007_v3  ;;  %v1073_v53 = vpop.f32.mrf.mxu1 }
 0x173   :  { %v1074_v58 = vadd.f32 %v1073_v53, %v643_v61 }
 0x175   :  { %v1047_v41 = vpop.f32.mrf.mxu2 }
 0x176   :  { %v1048_v14 = vadd.f32 %v1047_v41, %v1024_v42 }
 0x177   :  { %v1095_v48 = vpop.f32.mrf.mxu3 }
 0x178   :  { %v1158_v25 = vmax.f32 %v1048_v14, 0.0  ;;  %v1096_v41 = vadd.f32 %v1095_v48, %v1072_v1 }
 0x179   :  { %v1033_v28 = vpop.f32.mrf.mxu0 }
 0x17a   :  { %v1034_v50 = vadd.f32 %v1033_v28, %v1010_v33  ;;  %v1076_v23 = vpop.f32.mrf.mxu1 }
 0x17d   :  { %v1049_v19 = vpop.f32.mrf.mxu2 }
 0x17e   :  { %v1050_v22 = vadd.f32 %v1049_v19, %v1026_v11 }
 0x17f   :  { %v1097_v56 = vpop.f32.mrf.mxu3 }
 0x180   :  { %v1160_v26 = vmax.f32 %v1050_v22, 0.0  ;;  %v1098_v5 = vadd.f32 %v1097_v56, %v1074_v58 }
 0x181   :  { %v1035_v39 = vpop.f32.mrf.mxu0 }
 0x182   :  { %v1170_v27 = vpack.c.bf16 %v1160_v26, %v1158_v25  ;;  %v1036_v51 = vadd.f32 %v1035_v39, %v1012_v49  ;;  %v1078_v19 = vpop.f32.mrf.mxu1  ;;  %v1077_v25 = vadd.f32 %v1076_v23, %v643_v61  ;;  %v1406_v49 = vld [vmem:[%s2648_s8] sm:$0x3f] }
 0x183   :  { %v1079_v26 = vadd.f32 %v1078_v19, %v643_v61 }
 0x184   :  { %1316 = vmatmul.bf16.vlgmr.msra.gmra.mxu1 %v1170_v27 }
 0x185   :  { %v1052_v29 = vpop.f32.mrf.mxu2 }
 0x186   :  { %v1053_v38 = vadd.f32 %v1052_v29, %v1029_v21 }
 0x187   :  { %v1100_v4 = vpop.f32.mrf.mxu3 }
 0x188   :  { %v1162_v44 = vmax.f32 %v1053_v38, 0.0  ;;  %v1101_v36 = vadd.f32 %v1100_v4, %v1077_v25 }
 0x189   :  { %v1119_v18 = vpop.f32.mrf.mxu0 }
 0x18a   :  { %v1120_v6 = vadd.f32 %v1119_v18, %v1096_v41  ;;  %v1081_v28 = vpop.f32.mrf.mxu1 }
 0x18b   :  { %v1082_v39 = vadd.f32 %v1081_v28, %v643_v61 }
 0x18d   :  { %v1054_v40 = vpop.f32.mrf.mxu2 }
 0x18e   :  { %v1055_v15 = vadd.f32 %v1054_v40, %v1031_v37 }
 0x18f   :  { %v1102_v62 = vpop.f32.mrf.mxu3 }
 0x190   :  { %v1164_v16 = vmax.f32 %v1055_v15, 0.0  ;;  %v1103_v27 = vadd.f32 %v1102_v62, %v1079_v26 }
 0x191   :  { %v1121_v60 = vpop.f32.mrf.mxu0 }
 0x192   :  { %v1172_v47 = vpack.c.bf16 %v1164_v16, %v1162_v44  ;;  %v1122_v9 = vadd.f32 %v1121_v60, %v1098_v5  ;;  %v1083_v37 = vpop.f32.mrf.mxu1 }
 0x193   :  { %v1084_v15 = vadd.f32 %v1083_v37, %v643_v61 }
 0x194   :  { %1321 = vmatmul.bf16.gmra.mxu1 %v1172_v47 }
 0x195   :  { %v1057_v63 = vpop.f32.mrf.mxu2 }
 0x196   :  { %v1058_v52 = vadd.f32 %v1057_v63, %v1034_v50  ;;  %v2326_v50 = vmov 0  }
 0x197   :  { %v1105_v43 = vpop.f32.mrf.mxu3  ;;  %2213 = vset.pattern.permute.xlu0 %v2326_v50  ;;  %2214 = vset.pattern.permute.xlu2 %v2326_v50 }
 0x198   :  { %v1166_v57 = vmax.f32 %v1058_v52, 0.0  ;;  %v1106_v44 = vadd.f32 %v1105_v43, %v1082_v39  ;;  %1409 = vperm.xlu0 %2213, %v1406_v49   ;;  %2215 = vset.pattern.permute.xlu1 %v2326_v50  ;;  %v2216_v52 = vld [vmem:[%s2646_s6] ss:$0 sm:$0xff]  ;;  %s2327_s6 = smov [#allocation7]  }
 0x199   :  { %v1124_v8 = vpop.f32.mrf.mxu0 }
 0x19a   :  { %v1125_v46 = vadd.f32 %v1124_v8, %v1101_v36 }
 0x19d   :  { %v1059_v54 = vpop.f32.mrf.mxu2 }
 0x19e   :  { %v1060_v55 = vadd.f32 %v1059_v54, %v1036_v51  ;;  %v1362_v54 = vld [vmem:[%s2647_s7] sm:$0x3f]  ;;  %s1593_s7 = sshll.u32 %s2327_s6, 4  ;;  %s1594_s7 = int_to_ptr.vmem [resolvable:$true] %s1593_s7 }
 0x19f   :  { %v1107_v40 = vpop.f32.mrf.mxu3  ;;  %v1365_v8 = vrot.slane %v1362_v54, 2  ;;  %v1366_v62 = vrot.slane %v1362_v54, 3  ;;  %v1368_v37 = vrot.slane %v1362_v54, 5 }
 0x1a0   :  { %v1168_v59 = vmax.f32 %v1060_v55, 0.0  ;;  %v1108_v45 = vadd.f32 %v1107_v40, %v1084_v15 }
 0x1a1   :  { %v1126_v22 = vpop.f32.mrf.mxu0  ;;  %v1372_v36 = vperm.slane %v1366_v62, 0 }
 0x1a2   :  { %v1174_v13 = vpack.c.bf16 %v1168_v59, %v1166_v57  ;;  %v1127_v29 = vadd.f32 %v1126_v22, %v1103_v27  ;;  %v1369_v59 = vperm.slane %v1362_v54, 0 }
 0x1a4   :  { %1326 = vmatmul.bf16.gmra.mxu1 %v1174_v13  ;;  %v1364_v13 = vrot.slane %v1362_v54, 1 }
 0x1a5   :  { %v1143_v0 = vpop.f32.mrf.mxu2 }
 0x1a6   :  { %v1144_v17 = vadd.f32 %v1143_v0, %v1120_v6  ;;  %v1370_v4 = vperm.slane %v1364_v13, 0 }
 0x1a8   :  { %v1159_v11 = vmax.f32 %v1144_v17, 0.0 }
 0x1a9   :  { %v1129_v34 = vpop.f32.mrf.mxu0 }
 0x1aa   :  { %v1130_v47 = vadd.f32 %v1129_v34, %v1106_v44  ;;  %v1374_v44 = vperm.slane %v1368_v37, 0 }
 0x1ad   :  { %v1145_v10 = vpop.f32.mrf.mxu2 }
 0x1ae   :  { %v1146_v42 = vadd.f32 %v1145_v10, %v1122_v9 }
 0x1b0   :  { %v1161_v14 = vmax.f32 %v1146_v42, 0.0 }
 0x1b1   :  { %v1131_v16 = vpop.f32.mrf.mxu0 }
 0x1b2   :  { %v1171_v20 = vpack.c.bf16 %v1161_v14, %v1159_v11  ;;  %v1132_v12 = vadd.f32 %v1131_v16, %v1108_v45  ;;  %v1371_v14 = vperm.slane %v1365_v8, 0 }
 0x1b4   :  { %1340 = vmatmul.bf16.vlgmr.msra.gmra.mxu3 %v1171_v20 }
 0x1b5   :  { %v1148_v24 = vpop.f32.mrf.mxu2 }
 0x1b6   :  { %v1149_v30 = vadd.f32 %v1148_v24, %v1125_v46 }
 0x1b8   :  { %v1163_v3 = vmax.f32 %v1149_v30, 0.0 }
 0x1bd   :  { %v1150_v32 = vpop.f32.mrf.mxu2 }
 0x1be   :  { %v1151_v2 = vadd.f32 %v1150_v32, %v1127_v29  ;;  %v1367_v29 = vrot.slane %v1362_v54, 4 }
 0x1c0   :  { %v1165_v21 = vmax.f32 %v1151_v2, 0.0  ;;  %v1373_v34 = vperm.slane %v1367_v29, 0 }
 0x1c2   :  { %v1173_v35 = vpack.c.bf16 %v1165_v21, %v1163_v3 }
 0x1c4   :  { %1345 = vmatmul.bf16.gmra.mxu3 %v1173_v35 }
 0x1c5   :  { %v1153_v38 = vpop.f32.mrf.mxu2 }
 0x1c6   :  { %v1154_v48 = vadd.f32 %v1153_v38, %v1130_v47 }
 0x1c8   :  { %v1167_v18 = vmax.f32 %v1154_v48, 0.0 }
 0x1cd   :  { %v1155_v63 = vpop.f32.mrf.mxu2 }
 0x1ce   :  { %v1156_v7 = vadd.f32 %v1155_v63, %v1132_v12 }
 0x1d0   :  { %v1169_v31 = vmax.f32 %v1156_v7, 0.0 }
 0x1d2   :  { %v1175_v33 = vpack.c.bf16 %v1169_v31, %v1167_v18 }
 0x1d4   :  { %1350 = vmatmul.bf16.gmra.mxu3 %v1175_v33 }
 0x201   :  { %v1317_v51 = vpop.f32.mrf.mxu1 }
 0x202   :  { %v1318_v55 = vadd.f32 %v2216_v52, %v1317_v51 }
 0x209   :  { %v1319_v53 = vpop.f32.mrf.mxu1 }
 0x20a   :  { %v1320_v1 = vadd.f32 %v2216_v52, %v1319_v53  ;;  %v2629_v12 = vpop.permute.xlu0 %1409 }
 0x20b   :  { %v1411_v48 = vperm.slane %v2629_v12, 0  ;;  %v1412_v31 = vperm.slane %v2629_v12, 1  ;;  %v1413_v53 = vperm.slane %v2629_v12, 2  ;;  %v1414_v13 = vperm.slane %v2629_v12, 3 }
 0x211   :  { %v1322_v0 = vpop.f32.mrf.mxu1 }
 0x212   :  { %v1323_v9 = vadd.f32 %v2216_v52, %v1322_v0 }
 0x219   :  { %v1324_v10 = vpop.f32.mrf.mxu1 }
 0x21a   :  { %v1325_v22 = vadd.f32 %v2216_v52, %v1324_v10 }
 0x221   :  { %v1327_v27 = vpop.f32.mrf.mxu1 }
 0x222   :  { %v1328_v30 = vadd.f32 %v2216_v52, %v1327_v27 }
 0x229   :  { %v1329_v21 = vpop.f32.mrf.mxu1 }
 0x22a   :  { %v1330_v38 = vadd.f32 %v2216_v52, %v1329_v21 }
 0x237   :  { %v1341_v56 = vpop.f32.mrf.mxu3 }
 0x238   :  { %v1342_v57 = vadd.f32 %v1341_v56, %v1318_v55 }
 0x23a   :  { %v1356_v60 = vmax.f32 %v1342_v57, 0.0 }
 0x23c   :  { %v1381_v61 = vmul.f32 %v1369_v59, %v1356_v60 }
 0x23e   :  { %v1388_v23 = vsel %vm1387_vm3, %v1381_v61, 0.0 }
 0x23f   :  { %v1343_v58 = vpop.f32.mrf.mxu3  ;;  %1389 = vadd.xlane.f32.xlu0 %v1388_v23 }
 0x240   :  { %v1344_v41 = vadd.f32 %v1343_v58, %v1320_v1 }
 0x242   :  { %v1357_v5 = vmax.f32 %v1344_v41, 0.0 }
 0x244   :  { %v1382_v6 = vmul.f32 %v1370_v4, %v1357_v5 }
 0x246   :  { %v1391_v17 = vsel %vm1387_vm3, %v1382_v6, 0.0 }
 0x247   :  { %v1346_v42 = vpop.f32.mrf.mxu3  ;;  %1392 = vadd.xlane.f32.xlu1 %v1391_v17 }
 0x248   :  { %v1347_v11 = vadd.f32 %v1346_v42, %v1323_v9 }
 0x24a   :  { %v1358_v19 = vmax.f32 %v1347_v11, 0.0 }
 0x24c   :  { %v1383_v20 = vmul.f32 %v1371_v14, %v1358_v19  ;;  %v1415_v19 = vperm.slane %v2629_v12, 4 }
 0x24e   :  { %v1394_v24 = vsel %vm1387_vm3, %v1383_v20, 0.0 }
 0x24f   :  { %v1348_v25 = vpop.f32.mrf.mxu3  ;;  %1395 = vadd.xlane.f32.xlu1 %v1394_v24 }
 0x250   :  { %v1349_v26 = vadd.f32 %v1348_v25, %v1325_v22 }
 0x252   :  { %v1359_v46 = vmax.f32 %v1349_v26, 0.0 }
 0x254   :  { %v1384_v28 = vmul.f32 %v1372_v36, %v1359_v46 }
 0x256   :  { %v1397_v43 = vsel %vm1387_vm3, %v1384_v28, 0.0 }
 0x257   :  { %v1351_v32 = vpop.f32.mrf.mxu3  ;;  %1398 = vadd.xlane.f32.xlu2 %v1397_v43 }
 0x258   :  { %v1352_v2 = vadd.f32 %v1351_v32, %v1328_v30 }
 0x25a   :  { %v1360_v3 = vmax.f32 %v1352_v2, 0.0 }
 0x25c   :  { %v1385_v35 = vmul.f32 %v1373_v34, %v1360_v3  ;;  %v1416_v34 = vperm.slane %v2629_v12, 5 }
 0x25e   :  { %v1400_v39 = vsel %vm1387_vm3, %v1385_v35, 0.0 }
 0x25f   :  { %v1353_v40 = vpop.f32.mrf.mxu3  ;;  %1401 = vadd.xlane.f32.xlu2 %v1400_v39 }
 0x260   :  { %v1354_v15 = vadd.f32 %v1353_v40, %v1330_v38 }
 0x262   :  { %v1361_v16 = vmax.f32 %v1354_v15, 0.0 }
 0x264   :  { %v1386_v45 = vmul.f32 %v1374_v44, %v1361_v16 }
 0x266   :  { %v1403_v47 = vsel %vm1387_vm3, %v1386_v45, 0.0 }
 0x267   :  { %1404 = vadd.xlane.f32.xlu1 %v1403_v47 }
 0x2b2   :  { %v1390_v63 = vpop.xlane.xlu0 %1389 }
 0x2b3   :  { %v1423_v7 = vadd.f32 %v1411_v48, %v1390_v63 }
 0x2b5   :  { %v2082_v18 = vmul.f32 -1.442695, %v1423_v7 }
 0x2b7   :  { %2217 = vpow2.f32 %v2082_v18 }
 0x2ba   :  { %v1393_v33 = vpop.xlane.xlu1 %1392 }
 0x2bb   :  { %v1424_v49 = vadd.f32 %v1412_v31, %v1393_v33 }
 0x2bd   :  { %v2218_v50 = vpop.eup %2217  ;;  %v2083_v51 = vmul.f32 -1.442695, %v1424_v49 }
 0x2be   :  { %v1447_v52 = vadd.f32 1.0, %v2218_v50 }
 0x2bf   :  { %2219 = vpow2.f32 %v2083_v51 }
 0x2c0   :  { %2221 = vrcp.f32 %v1447_v52  ;;  %v1464_v23 = vand.u32 2147483648, %v1447_v52  ;;  %v1462_v4 = vand.u32 2147483647, %v1447_v52  ;;  %vm1458_vm5 = vweird.f32 %v1447_v52 }
 0x2c2   :  { %v1396_v54 = vpop.xlane.xlu1 %1395  ;;  %v1465_v10 = vor.u32 1.1754944e-38, %v1464_v23  ;;  %vm1463_vm7 = vcmp.eq.f32.partialorder %v1462_v4, 8.507059e+37 }
 0x2c3   :  { %v1425_v55 = vadd.f32 %v1413_v53, %v1396_v54 }
 0x2c5   :  { %v2220_v56 = vpop.eup %2219  ;;  %v2084_v57 = vmul.f32 -1.442695, %v1425_v55 }
 0x2c6   :  { %v2222_v59 = vpop.eup %2221  ;;  %v1448_v60 = vadd.f32 1.0, %v2220_v56 }
 0x2c7   :  { %2223 = vpow2.f32 %v2084_v57  ;;  %v1454_v61 = vmul.f32 %v2222_v59, %v1447_v52  ;;  %vm1459_vm4 = vweird.f32 %v2222_v59 }
 0x2c8   :  { %2225 = vrcp.f32 %v1448_v60  ;;  %vm1460_vm6 = vmor %vm1458_vm5, %vm1459_vm4  ;;  %v1479_v22 = vand.u32 2147483648, %v1448_v60  ;;  %v1477_v26 = vand.u32 2147483647, %v1448_v60  ;;  %vm1473_vm9 = vweird.f32 %v1448_v60 }
 0x2c9   :  { %v1455_v0 = vsub.f32 1.0, %v1454_v61 }
 0x2ca   :  { %v1399_v1 = vpop.xlane.xlu2 %1398  ;;  %v1480_v30 = vor.u32 1.1754944e-38, %v1479_v22  ;;  %vm1478_vm11 = vcmp.eq.f32.partialorder %v1477_v26, 8.507059e+37 }
 0x2cb   :  { %v1426_v58 = vadd.f32 %v1414_v13, %v1399_v1  ;;  %v1456_v41 = vmul.f32 %v2222_v59, %v1455_v0 }
 0x2cd   :  { %v2224_v5 = vpop.eup %2223  ;;  %v2085_v6 = vmul.f32 -1.442695, %v1426_v58  ;;  %v1457_v8 = vadd.f32 %v2222_v59, %v1456_v41 }
 0x2ce   :  { %v2226_v9 = vpop.eup %2225  ;;  %v1449_v17 = vadd.f32 1.0, %v2224_v5 }
 0x2cf   :  { %2227 = vpow2.f32 %v2085_v6  ;;  %v1461_v42 = vsel %vm1460_vm6, %v2222_v59, %v1457_v8  ;;  %v1469_v11 = vmul.f32 %v2226_v9, %v1448_v60  ;;  %vm1474_vm8 = vweird.f32 %v2226_v9 }
 0x2d0   :  { %2229 = vrcp.f32 %v1449_v17  ;;  %v1466_v14 = vsel %vm1463_vm7, %v1465_v10, %v1461_v42  ;;  %vm1475_vm10 = vmor %vm1473_vm9, %vm1474_vm8  ;;  %v1494_v35 = vand.u32 2147483648, %v1449_v17  ;;  %v1492_v39 = vand.u32 2147483647, %v1449_v17 }
 0x2d1   :  { %1550 = vperm.xlu2 %2214, %v1466_v14   ;;  %v1470_v20 = vsub.f32 1.0, %v1469_v11  ;;  %vm1488_vm13 = vweird.f32 %v1449_v17  ;;  %v1567_v14 = vlaneseq }
 0x2d2   :  { %v1402_v62 = vpop.xlane.xlu2 %1401  ;;  %v1495_v47 = vor.u32 1.1754944e-38, %v1494_v35  ;;  %vm1493_vm15 = vcmp.eq.f32.partialorder %v1492_v39, 8.507059e+37 }
 0x2d3   :  { %v1427_v24 = vadd.f32 %v1415_v19, %v1402_v62  ;;  %v1471_v25 = vmul.f32 %v2226_v9, %v1470_v20  ;;  %v1568_v62 = vand.u32 127, %v1567_v14 }
 0x2d5   :  { %v2228_v36 = vpop.eup %2227  ;;  %v2086_v27 = vmul.f32 -1.442695, %v1427_v24  ;;  %v1472_v46 = vadd.f32 %v2226_v9, %v1471_v25 }
 0x2d6   :  { %v2230_v28 = vpop.eup %2229  ;;  %v1450_v29 = vadd.f32 1.0, %v2228_v36 }
 0x2d7   :  { %2231 = vpow2.f32 %v2086_v27  ;;  %v1476_v43 = vsel %vm1475_vm10, %v2226_v9, %v1472_v46  ;;  %v1484_v32 = vmul.f32 %v2230_v28, %v1449_v17  ;;  %vm1489_vm12 = vweird.f32 %v2230_v28 }
 0x2d8   :  { %2233 = vrcp.f32 %v1450_v29  ;;  %v1481_v2 = vsel %vm1478_vm11, %v1480_v30, %v1476_v43  ;;  %vm1490_vm14 = vmor %vm1488_vm13, %vm1489_vm12  ;;  %v1509_v18 = vand.u32 2147483648, %v1450_v29  ;;  %v1507_v33 = vand.u32 2147483647, %v1450_v29 }
 0x2d9   :  { %1553 = vperm.xlu1 %2215, %v1481_v2   ;;  %v1485_v3 = vsub.f32 1.0, %v1484_v32  ;;  %vm1503_vm1 = vweird.f32 %v1450_v29  ;;  %vm1575_vm12 = vcmask 1041409   ;;  %vm1577_vm13 = vcmask 1042434  }
 0x2da   :  { %v1405_v21 = vpop.xlane.xlu1 %1404  ;;  %v1510_v53 = vor.u32 1.1754944e-38, %v1509_v18  ;;  %vm1508_vm3 = vcmp.eq.f32.partialorder %v1507_v33, 8.507059e+37 }
 0x2db   :  { %v1428_v37 = vadd.f32 %v1416_v34, %v1405_v21  ;;  %v1486_v38 = vmul.f32 %v2230_v28, %v1485_v3 }
 0x2dd   :  { %v2232_v40 = vpop.eup %2231  ;;  %v2087_v15 = vmul.f32 -1.442695, %v1428_v37  ;;  %v1487_v44 = vadd.f32 %v2230_v28, %v1486_v38 }
 0x2de   :  { %v2234_v16 = vpop.eup %2233  ;;  %v1451_v45 = vadd.f32 1.0, %v2232_v40 }
 0x2df   :  { %2235 = vpow2.f32 %v2087_v15  ;;  %v1491_v48 = vsel %vm1490_vm14, %v2230_v28, %v1487_v44  ;;  %v1499_v63 = vmul.f32 %v2234_v16, %v1450_v29  ;;  %vm1504_vm0 = vweird.f32 %v2234_v16 }
 0x2e0   :  { %2237 = vrcp.f32 %v1451_v45  ;;  %v1496_v12 = vsel %vm1493_vm15, %v1495_v47, %v1491_v48  ;;  %vm1505_vm2 = vmor %vm1503_vm1, %vm1504_vm0  ;;  %v1524_v59 = vand.u32 2147483648, %v1451_v45  ;;  %v1522_v61 = vand.u32 2147483647, %v1451_v45 }
 0x2e1   :  { %1556 = vperm.xlu2 %2214, %v1496_v12   ;;  %v1500_v7 = vsub.f32 1.0, %v1499_v63  ;;  %vm1518_vm5 = vweird.f32 %v1451_v45  ;;  %vm1579_vm14 = vcmask 1043459   ;;  %vm1581_vm15 = vcmask 1044484  }
 0x2e2   :  { %v1525_v1 = vor.u32 1.1754944e-38, %v1524_v59  ;;  %vm1523_vm7 = vcmp.eq.f32.partialorder %v1522_v61, 8.507059e+37  ;;  %vm1583_vm0 = vcmask 1045509   ;;  %vm1586_vm1 = vcmask 62464  }
 0x2e3   :  { %v1501_v31 = vmul.f32 %v2234_v16, %v1500_v7 }
 0x2e5   :  { %v2236_v49 = vpop.eup %2235  ;;  %v1502_v50 = vadd.f32 %v2234_v16, %v1501_v31 }
 0x2e6   :  { %v2238_v51 = vpop.eup %2237  ;;  %v1452_v52 = vadd.f32 1.0, %v2236_v49 }
 0x2e7   :  { %v1506_v54 = vsel %vm1505_vm2, %v2234_v16, %v1502_v50  ;;  %v1514_v55 = vmul.f32 %v2238_v51, %v1451_v45  ;;  %vm1519_vm4 = vweird.f32 %v2238_v51 }
 0x2e8   :  { %2239 = vrcp.f32 %v1452_v52  ;;  %v1511_v56 = vsel %vm1508_vm3, %v1510_v53, %v1506_v54  ;;  %vm1520_vm6 = vmor %vm1518_vm5, %vm1519_vm4  ;;  %v1539_v5 = vand.u32 2147483648, %v1452_v52  ;;  %v1537_v8 = vand.u32 2147483647, %v1452_v52 }
 0x2e9   :  { %1559 = vperm.xlu2 %2214, %v1511_v56   ;;  %v1515_v57 = vsub.f32 1.0, %v1514_v55  ;;  %vm1533_vm9 = vweird.f32 %v1452_v52 }
 0x2ea   :  { %v1540_v17 = vor.u32 1.1754944e-38, %v1539_v5  ;;  %vm1538_vm11 = vcmp.eq.f32.partialorder %v1537_v8, 8.507059e+37 }
 0x2eb   :  { %v1516_v60 = vmul.f32 %v2238_v51, %v1515_v57 }
 0x2ed   :  { %v1517_v13 = vadd.f32 %v2238_v51, %v1516_v60 }
 0x2ee   :  { %v2240_v0 = vpop.eup %2239 }
 0x2ef   :  { %v1521_v23 = vsel %vm1520_vm6, %v2238_v51, %v1517_v13  ;;  %v1529_v58 = vmul.f32 %v2240_v0, %v1452_v52  ;;  %vm1534_vm8 = vweird.f32 %v2240_v0 }
 0x2f0   :  { %v1526_v41 = vsel %vm1523_vm7, %v1525_v1, %v1521_v23  ;;  %vm1535_vm10 = vmor %vm1533_vm9, %vm1534_vm8 }
 0x2f1   :  { %1562 = vperm.xlu1 %2215, %v1526_v41   ;;  %v1530_v4 = vsub.f32 1.0, %v1529_v58 }
 0x2f3   :  { %v1531_v6 = vmul.f32 %v2240_v0, %v1530_v4 }
 0x2f5   :  { %v1532_v9 = vadd.f32 %v2240_v0, %v1531_v6 }
 0x2f7   :  { %v1536_v10 = vsel %vm1535_vm10, %v2240_v0, %v1532_v9 }
 0x2f8   :  { %v1541_v42 = vsel %vm1538_vm11, %v1540_v17, %v1536_v10 }
 0x2f9   :  { %1565 = vperm.xlu0 %2213, %v1541_v42  }
 0x32b   :  { %v1551_v11 = vpop.permute.xlu2 %1550 }
 0x32c   :  { %v1569_v24 = vperm.slane %v1551_v11, %v1568_v62 }
 0x33b   :  { %v1557_v19 = vpop.permute.xlu2 %1556 }
 0x33c   :  { %v1571_v36 = vperm.slane %v1557_v19, %v1568_v62 }
 0x343   :  { %v1560_v27 = vpop.permute.xlu2 %1559 }
 0x344   :  { %v1572_v29 = vperm.slane %v1560_v27, %v1568_v62 }
 0x34b   :  { %v1554_v20 = vpop.permute.xlu1 %1553 }
 0x34c   :  { %v1570_v22 = vperm.slane %v1554_v20, %v1568_v62 }
 0x34e   :  { %v1576_v25 = vsel %vm1575_vm12, %v1570_v22, %v1569_v24 }
 0x34f   :  { %v1578_v46 = vsel %vm1577_vm13, %v1571_v36, %v1576_v25 }
 0x350   :  { %v1580_v43 = vsel %vm1579_vm14, %v1572_v29, %v1578_v46 }
 0x363   :  { %v1563_v26 = vpop.permute.xlu1 %1562 }
 0x364   :  { %v1573_v28 = vperm.slane %v1563_v26, %v1568_v62 }
 0x366   :  { %v1582_v2 = vsel %vm1581_vm15, %v1573_v28, %v1580_v43 }
 0x36b   :  { %v1566_v30 = vpop.permute.xlu0 %1565 }
 0x36c   :  { %v1574_v32 = vperm.slane %v1566_v30, %v1568_v62 }
 0x36e   :  { %v1584_v34 = vsel %vm1583_vm0, %v1574_v32, %v1582_v2 }
 0x36f   :  { %1587 = vst.msk [vmem:[#allocation7] sm:$0x3f] %vm1586_vm1, %v1584_v34 }
 0x370   :  { %1598 = dma.vmem_to_hbm [thread:$0]  %s1594_s7, 128, %s1596_s15, [#allocation4]  }
 0x371   :  { %2317 = dma.done.wait [#allocation4], 128  }
 0x372   :  { %2318 = vsyncadd [#allocation4], 4294967168 }
 0x373   :  { %1603 = vsyncpa [#allocation3], 1 }
 0x374   :  { %1604 = vsyncpa [#allocation6], 1 }
 0x375   :  { %1605 = vsyncpa [#allocation4], 1 }

</bundles_post_ra>
